<compile_context>
chip_gen: v7x
topology: tpu7x:2x2x1
jax: 0.10.0
libtpu: 0.0.40
codegen_flags: <defaults>
</compile_context>

<pallas_src>
import jax
import jax.numpy as jnp
from jax.experimental import pallas as pl
from jax.experimental.pallas import tpu as pltpu


def deepset_kernel(x_ref, w1_ref, wh_ref, b_ref, o_ref):
    # x_ref block: [TB, S, D]; w1 [D, Hp]; wh [5, Hp, Hp]; b [6, Hp] (f32).
    TB, S, D = x_ref.shape
    Hp = w1_ref.shape[1]
    cdtype = w1_ref.dtype            # bf16 (default) or f32 matmul operands

    x = x_ref[...].reshape(TB * S, D)      # flatten batch*set rows (S % 8 == 0)
    b = b_ref[...]                         # [6, Hp], f32

    # ---- encoder: Linear -> ReLU -> Linear -> ReLU -> Linear ----
    # Matmul operands in cdtype, accumulation + elementwise in f32.
    h = jnp.dot(x, w1_ref[...], preferred_element_type=jnp.float32) + b[0:1, :]
    h = jnp.maximum(h, 0.0)
    h = jnp.dot(h.astype(cdtype), wh_ref[0],
                preferred_element_type=jnp.float32) + b[1:2, :]
    h = jnp.maximum(h, 0.0)
    h = jnp.dot(h.astype(cdtype), wh_ref[1],
                preferred_element_type=jnp.float32) + b[2:3, :]

    # ---- set reduction (mean): 1/S is pre-folded into wh[2] on the host ----
    m = h.reshape(TB, S, Hp).sum(axis=1)   # [TB, Hp], f32 (XLU, free slot)

    # ---- decoder: Linear -> ReLU -> Linear -> ReLU -> Linear (batched) ----
    d = jnp.dot(m.astype(cdtype), wh_ref[2],
                preferred_element_type=jnp.float32) + b[3:4, :]
    d = jnp.maximum(d, 0.0)
    d = jnp.dot(d.astype(cdtype), wh_ref[3],
                preferred_element_type=jnp.float32) + b[4:5, :]
    d = jnp.maximum(d, 0.0)
    d = jnp.dot(d.astype(cdtype), wh_ref[4],
                preferred_element_type=jnp.float32) + b[5:6, :]

    o_ref[...] = d.astype(o_ref.dtype)     # [TB, Hp], lane-dense store


def deepset_forward(x, params, tb=256, use_bf16=True):
    """x: [B, S, D] float32. params: dict of weights/biases. Returns [B, H]."""
    B, S, D = x.shape
    H = params["w1"].shape[1]
    Hp = ((H + 127) // 128) * 128              # lane-pad hidden width to 128

    # S must be a sublane multiple so the (TB,S,D)->(TB*S,D) and
    # (TB*S,Hp)->(TB,S,Hp) reshapes stay free (no VMEM relayout).
    # TODO(synk): support S % 8 != 0 via an in-kernel row mask on the set-sum.
    assert S % 8 == 0, "set size S must be a multiple of 8"

    # TB: multiple of 8 (sublane-dense output). Clamp for small batches so we
    # don't DMA/compute on mostly-zero padding rows. For v7x megacore, callers
    # with large B should keep tb such that B_pad // tb >= 2 (default 256 does
    # this for B >= 512).
    tb = max(8, (tb // 8) * 8)
    tb = min(tb, ((B + 7) // 8) * 8)
    B_pad = ((B + tb - 1) // tb) * tb
    num_tiles = B_pad // tb

    cdtype = jnp.bfloat16 if use_bf16 else jnp.float32

    # --- host-side weight prep (zero padding is semantically exact) ---
    def pad_hh(w):
        return jnp.pad(w, ((0, Hp - H), (0, Hp - H)))

    w1 = jnp.pad(params["w1"], ((0, 0), (0, Hp - H))).astype(cdtype)  # [D, Hp]
    wh = jnp.stack([
        pad_hh(params["w2"]),
        pad_hh(params["w3"]),
        pad_hh(params["w4"] / S),        # fold the set-mean's 1/S into w4
        pad_hh(params["w5"]),
        pad_hh(params["w6"]),
    ]).astype(cdtype)                                                  # [5,Hp,Hp]
    b = jnp.stack([jnp.pad(params[f"b{i}"], (0, Hp - H))
                   for i in range(1, 7)]).astype(jnp.float32)          # [6, Hp]

    # Cast x to the matmul dtype; append only the batch remainder (no full
    # re-pad of the dominant input when B is already tile-aligned).
    x_c = x.astype(cdtype)
    if B_pad != B:
        x_c = jnp.concatenate(
            [x_c, jnp.zeros((B_pad - B, S, D), dtype=cdtype)], axis=0)

    in_specs = [
        pl.BlockSpec((tb, S, D), lambda i: (i, 0, 0)),                # x tile
        pl.BlockSpec((D, Hp), lambda i: (0, 0),
                     pipeline_mode=pl.Buffered(1)),                   # w1
        pl.BlockSpec((5, Hp, Hp), lambda i: (0, 0, 0),
                     pipeline_mode=pl.Buffered(1)),                   # packed HxH
        pl.BlockSpec((6, Hp), lambda i: (0, 0),
                     pipeline_mode=pl.Buffered(1)),                   # packed biases
    ]
    out_spec = pl.BlockSpec((tb, Hp), lambda i: (i, 0))

    fn = pl.pallas_call(
        deepset_kernel,
        out_shape=jax.ShapeDtypeStruct((B_pad, Hp), jnp.float32),
        grid_spec=pltpu.PrefetchScalarGridSpec(
            num_scalar_prefetch=0,
            grid=(num_tiles,),
            in_specs=in_specs,
            out_specs=out_spec,
        ),
        compiler_params=pltpu.CompilerParams(
            dimension_semantics=("parallel",),
            vmem_limit_bytes=32 * 1024 * 1024,
        ),
    )

    out = fn(x_c, w1, wh, b)
    return out[:B, :H]


def deepset_reference(x, params):
    """Pure-JAX f32 reference mirroring the PyTorch module semantics."""
    h = jnp.maximum(x @ params["w1"] + params["b1"], 0.0)
    h = jnp.maximum(h @ params["w2"] + params["b2"], 0.0)
    h = h @ params["w3"] + params["b3"]
    m = h.mean(axis=-2)
    d = jnp.maximum(m @ params["w4"] + params["b4"], 0.0)
    d = jnp.maximum(d @ params["w5"] + params["b5"], 0.0)
    d = d @ params["w6"] + params["b6"]
    return d


def init_params(key, input_dim, hidden_dim):
    """Deterministic init matching torch.nn.Linear shapes (stored transposed:
    weight [in, out], bias [out])."""
    dims = [
        (input_dim, hidden_dim),   # encoder L1
        (hidden_dim, hidden_dim),  # encoder L2
        (hidden_dim, hidden_dim),  # encoder L3
        (hidden_dim, hidden_dim),  # decoder L1
        (hidden_dim, hidden_dim),  # decoder L2
        (hidden_dim, hidden_dim),  # decoder L3
    ]
    params = {}
    for i, (fan_in, fan_out) in enumerate(dims, start=1):
        key, kw, kb = jax.random.split(key, 3)
        bound = 1.0 / jnp.sqrt(fan_in)
        params[f"w{i}"] = jax.random.uniform(
            kw, (fan_in, fan_out), jnp.float32, -bound, bound)
        params[f"b{i}"] = jax.random.uniform(
            kb, (fan_out,), jnp.float32, -bound, bound)
    return params


if __name__ == "__main__":
    INPUT_DIM = 1024
    HIDDEN_DIM = 64
    B, S = 2, 8   # batch of 2 sets, 8 elements each

    key = jax.random.PRNGKey(0)
    key, kx = jax.random.split(key)
    x = jax.random.normal(kx, (B, S, INPUT_DIM), dtype=jnp.float32)

    params = init_params(key, INPUT_DIM, HIDDEN_DIM)
    ref = deepset_reference(x, params)

    # f32-operand path: tight tolerance against the f32 reference.
    out_f32 = jax.block_until_ready(deepset_forward(x, params, use_bf16=False))
    assert out_f32.shape == (B, HIDDEN_DIM)
    assert jnp.allclose(out_f32, ref, atol=1e-4, rtol=1e-4), (
        f"f32 path max abs err = {jnp.max(jnp.abs(out_f32 - ref))}")

    # bf16-operand path (the performant default): bf16 rounding over the
    # D=1024 contraction needs a looser tolerance vs. the f32 reference.
    out_bf16 = jax.block_until_ready(deepset_forward(x, params))
    assert out_bf16.shape == (B, HIDDEN_DIM)
    assert jnp.allclose(out_bf16, ref, atol=2e-2, rtol=2e-2), (
        f"bf16 path max abs err = {jnp.max(jnp.abs(out_bf16 - ref))}")

    print("KERNEL_OK")
</pallas_src>

<mosaic_0001>
module attributes {stable_mosaic.version = 11 : i64} {
  func.func @deepset_kernel(%arg0: i32, %arg1: memref<8x8x1024xf32, #tpu.memory_space<vmem>>, %arg2: memref<1024x128xf32, #tpu.memory_space<vmem>>, %arg3: memref<5x128x128xf32, #tpu.memory_space<vmem>>, %arg4: memref<6x128xf32, #tpu.memory_space<vmem>>, %arg5: memref<8x128xf32, #tpu.memory_space<vmem>>) attributes {dimension_semantics = [#tpu.dimension_semantics<parallel>], iteration_bounds = array<i64: 1>, scalar_prefetch = 0 : i64, scratch_operands = 0 : i64, tpu.core_type = #tpu.core_type<tc>, window_params = [{transform_indices = @transform_0, window_bounds = array<i64: 8, 8, 1024>}, {pipeline_mode = #tpu.pipeline_mode<synchronous>, transform_indices = @transform_1, window_bounds = array<i64: 1024, 128>}, {pipeline_mode = #tpu.pipeline_mode<synchronous>, transform_indices = @transform_2, window_bounds = array<i64: 5, 128, 128>}, {pipeline_mode = #tpu.pipeline_mode<synchronous>, transform_indices = @transform_3, window_bounds = array<i64: 6, 128>}, {transform_indices = @transform_4, window_bounds = array<i64: 8, 128>}]} {
    %c0 = arith.constant 0 : index
    %c0_0 = arith.constant 0 : index
    %c0_1 = arith.constant 0 : index
    %0 = vector.load %arg1[%c0, %c0_0, %c0_1] : memref<8x8x1024xf32, #tpu.memory_space<vmem>>, vector<8x8x1024xf32>
    %1 = vector.shape_cast %0 : vector<8x8x1024xf32> to vector<64x1024xf32>
    %c0_2 = arith.constant 0 : index
    %c0_3 = arith.constant 0 : index
    %2 = vector.load %arg4[%c0_2, %c0_3] : memref<6x128xf32, #tpu.memory_space<vmem>>, vector<6x128xf32>
    %c0_4 = arith.constant 0 : index
    %c0_5 = arith.constant 0 : index
    %3 = vector.load %arg2[%c0_4, %c0_5] : memref<1024x128xf32, #tpu.memory_space<vmem>>, vector<1024x128xf32>
    %cst = arith.constant dense<0.000000e+00> : vector<64x128xf32>
    %4 = tpu.matmul %1, %3, %cst {dimension_numbers = #tpu.dot_dimension_numbers<[1], [0], [0], [1], [0, 0, 1, 1], [], []>} : vector<64x1024xf32>, vector<1024x128xf32>, vector<64x128xf32> -> vector<64x128xf32>
    %5 = vector.extract_strided_slice %2 {offsets = [0, 0], sizes = [1, 128], strides = [1, 1]} : vector<6x128xf32> to vector<1x128xf32>
    %6 = vector.broadcast %5 : vector<1x128xf32> to vector<64x128xf32>
    %7 = arith.addf %4, %6 : vector<64x128xf32>
    %cst_6 = arith.constant 0.000000e+00 : f32
    %8 = vector.broadcast %cst_6 : f32 to vector<64x128xf32>
    %9 = arith.maximumf %7, %8 : vector<64x128xf32>
    %c0_7 = arith.constant 0 : index
    %c0_8 = arith.constant 0 : index
    %c0_9 = arith.constant 0 : index
    %10 = vector.load %arg3[%c0_7, %c0_8, %c0_9] : memref<5x128x128xf32, #tpu.memory_space<vmem>>, vector<1x128x128xf32>
    %11 = vector.shape_cast %10 : vector<1x128x128xf32> to vector<128x128xf32>
    %cst_10 = arith.constant dense<0.000000e+00> : vector<64x128xf32>
    %12 = tpu.matmul %9, %11, %cst_10 {dimension_numbers = #tpu.dot_dimension_numbers<[1], [0], [0], [1], [0, 0, 1, 1], [], []>} : vector<64x128xf32>, vector<128x128xf32>, vector<64x128xf32> -> vector<64x128xf32>
    %13 = vector.extract_strided_slice %2 {offsets = [1, 0], sizes = [1, 128], strides = [1, 1]} : vector<6x128xf32> to vector<1x128xf32>
    %14 = vector.broadcast %13 : vector<1x128xf32> to vector<64x128xf32>
    %15 = arith.addf %12, %14 : vector<64x128xf32>
    %cst_11 = arith.constant 0.000000e+00 : f32
    %16 = vector.broadcast %cst_11 : f32 to vector<64x128xf32>
    %17 = arith.maximumf %15, %16 : vector<64x128xf32>
    %c1 = arith.constant 1 : index
    %c0_12 = arith.constant 0 : index
    %c0_13 = arith.constant 0 : index
    %18 = vector.load %arg3[%c1, %c0_12, %c0_13] : memref<5x128x128xf32, #tpu.memory_space<vmem>>, vector<1x128x128xf32>
    %19 = vector.shape_cast %18 : vector<1x128x128xf32> to vector<128x128xf32>
    %cst_14 = arith.constant dense<0.000000e+00> : vector<64x128xf32>
    %20 = tpu.matmul %17, %19, %cst_14 {dimension_numbers = #tpu.dot_dimension_numbers<[1], [0], [0], [1], [0, 0, 1, 1], [], []>} : vector<64x128xf32>, vector<128x128xf32>, vector<64x128xf32> -> vector<64x128xf32>
    %21 = vector.extract_strided_slice %2 {offsets = [2, 0], sizes = [1, 128], strides = [1, 1]} : vector<6x128xf32> to vector<1x128xf32>
    %22 = vector.broadcast %21 : vector<1x128xf32> to vector<64x128xf32>
    %23 = arith.addf %20, %22 : vector<64x128xf32>
    %24 = vector.shape_cast %23 : vector<64x128xf32> to vector<8x8x128xf32>
    %cst_15 = arith.constant dense<0.000000e+00> : vector<8x128xf32>
    %25 = vector.multi_reduction <add>, %24, %cst_15 [1] : vector<8x8x128xf32> to vector<8x128xf32>
    %c2 = arith.constant 2 : index
    %c0_16 = arith.constant 0 : index
    %c0_17 = arith.constant 0 : index
    %26 = vector.load %arg3[%c2, %c0_16, %c0_17] : memref<5x128x128xf32, #tpu.memory_space<vmem>>, vector<1x128x128xf32>
    %27 = vector.shape_cast %26 : vector<1x128x128xf32> to vector<128x128xf32>
    %cst_18 = arith.constant dense<0.000000e+00> : vector<8x128xf32>
    %28 = tpu.matmul %25, %27, %cst_18 {dimension_numbers = #tpu.dot_dimension_numbers<[1], [0], [0], [1], [0, 0, 1, 1], [], []>} : vector<8x128xf32>, vector<128x128xf32>, vector<8x128xf32> -> vector<8x128xf32>
    %29 = vector.extract_strided_slice %2 {offsets = [3, 0], sizes = [1, 128], strides = [1, 1]} : vector<6x128xf32> to vector<1x128xf32>
    %30 = vector.broadcast %29 : vector<1x128xf32> to vector<8x128xf32>
    %31 = arith.addf %28, %30 : vector<8x128xf32>
    %cst_19 = arith.constant 0.000000e+00 : f32
    %32 = vector.broadcast %cst_19 : f32 to vector<8x128xf32>
    %33 = arith.maximumf %31, %32 : vector<8x128xf32>
    %c3 = arith.constant 3 : index
    %c0_20 = arith.constant 0 : index
    %c0_21 = arith.constant 0 : index
    %34 = vector.load %arg3[%c3, %c0_20, %c0_21] : memref<5x128x128xf32, #tpu.memory_space<vmem>>, vector<1x128x128xf32>
    %35 = vector.shape_cast %34 : vector<1x128x128xf32> to vector<128x128xf32>
    %cst_22 = arith.constant dense<0.000000e+00> : vector<8x128xf32>
    %36 = tpu.matmul %33, %35, %cst_22 {dimension_numbers = #tpu.dot_dimension_numbers<[1], [0], [0], [1], [0, 0, 1, 1], [], []>} : vector<8x128xf32>, vector<128x128xf32>, vector<8x128xf32> -> vector<8x128xf32>
    %37 = vector.extract_strided_slice %2 {offsets = [4, 0], sizes = [1, 128], strides = [1, 1]} : vector<6x128xf32> to vector<1x128xf32>
    %38 = vector.broadcast %37 : vector<1x128xf32> to vector<8x128xf32>
    %39 = arith.addf %36, %38 : vector<8x128xf32>
    %cst_23 = arith.constant 0.000000e+00 : f32
    %40 = vector.broadcast %cst_23 : f32 to vector<8x128xf32>
    %41 = arith.maximumf %39, %40 : vector<8x128xf32>
    %c4 = arith.constant 4 : index
    %c0_24 = arith.constant 0 : index
    %c0_25 = arith.constant 0 : index
    %42 = vector.load %arg3[%c4, %c0_24, %c0_25] : memref<5x128x128xf32, #tpu.memory_space<vmem>>, vector<1x128x128xf32>
    %43 = vector.shape_cast %42 : vector<1x128x128xf32> to vector<128x128xf32>
    %cst_26 = arith.constant dense<0.000000e+00> : vector<8x128xf32>
    %44 = tpu.matmul %41, %43, %cst_26 {dimension_numbers = #tpu.dot_dimension_numbers<[1], [0], [0], [1], [0, 0, 1, 1], [], []>} : vector<8x128xf32>, vector<128x128xf32>, vector<8x128xf32> -> vector<8x128xf32>
    %45 = vector.extract_strided_slice %2 {offsets = [5, 0], sizes = [1, 128], strides = [1, 1]} : vector<6x128xf32> to vector<1x128xf32>
    %46 = vector.broadcast %45 : vector<1x128xf32> to vector<8x128xf32>
    %47 = arith.addf %44, %46 : vector<8x128xf32>
    %c0_27 = arith.constant 0 : index
    %c0_28 = arith.constant 0 : index
    %48 = vector.load %arg5[%c0_27, %c0_28] : memref<8x128xf32, #tpu.memory_space<vmem>>, vector<8x128xf32>
    tpu.vector_store %arg5[%c0_27, %c0_28], %47 {strides = array<i32>} : memref<8x128xf32, #tpu.memory_space<vmem>>, vector<8x128xf32>,
    return
  }
  func.func @transform_0(%arg0: i32) -> (i32, i32, i32) {
    %c0_i32 = arith.constant 0 : i32
    %c0_i32_0 = arith.constant 0 : i32
    %c0_i32_1 = arith.constant 0 : i32
    return %arg0, %c0_i32, %c0_i32_0 : i32, i32, i32
  }
  func.func @transform_1(%arg0: i32) -> (i32, i32) {
    %c0_i32 = arith.constant 0 : i32
    %c0_i32_0 = arith.constant 0 : i32
    %c0_i32_1 = arith.constant 0 : i32
    return %c0_i32, %c0_i32_0 : i32, i32
  }
  func.func @transform_2(%arg0: i32) -> (i32, i32, i32) {
    %c0_i32 = arith.constant 0 : i32
    %c0_i32_0 = arith.constant 0 : i32
    %c0_i32_1 = arith.constant 0 : i32
    %c0_i32_2 = arith.constant 0 : i32
    return %c0_i32, %c0_i32_0, %c0_i32_1 : i32, i32, i32
  }
  func.func @transform_3(%arg0: i32) -> (i32, i32) {
    %c0_i32 = arith.constant 0 : i32
    %c0_i32_0 = arith.constant 0 : i32
    %c0_i32_1 = arith.constant 0 : i32
    return %c0_i32, %c0_i32_0 : i32, i32
  }
  func.func @transform_4(%arg0: i32) -> (i32, i32) {
    %c0_i32 = arith.constant 0 : i32
    %c0_i32_0 = arith.constant 0 : i32
    return %arg0, %c0_i32 : i32, i32
  }
}

</mosaic_0001>

<bundles_post_ra>
// kernel: tpu_custom_call.1
= control target key start
LH: loop header
LB: loop body
LE: loop exit
PB: predicated region body
PF: predicated region fallthrough
CT: control target
= control target key end

     0   :  { %9 = vsyncpa [#allocation3], 0  ;;  %s2348_s0 = inlined_call_operand.hbm [shape: f32[8,8,1024], index: 0, kind: input, shape index: {}]   ;;  %s2349_s1 = inlined_call_operand.hbm [shape: f32[1024,128], index: 1, kind: input, shape index: {}]   ;;  %s2350_s2 = inlined_call_operand.hbm [shape: f32[5,128,128], index: 2, kind: input, shape index: {}]   ;;  %s2351_s3 = inlined_call_operand.vmem [shape: f32[6,128], index: 3, kind: input, shape index: {}]   ;;  %s2352_s4 = inlined_call_operand.hbm [shape: f32[8,128], index: 4, kind: output, shape index: {}]  }
   0x1   :  { %10 = vsyncpa [#allocation6], 0 }
   0x2   :  { %11 = vsyncpa [#allocation4], 0  ;;  %s2191_s15 = smov [#allocation5]   ;;  %s2097_s19 = scalar_lea.hbm %s2349_s1, 16384 }
   0x3   :  { %s29_s16 = sshll.u32 %s2191_s15, 4  ;;  %p2098_p0 = scmp.ne.s32.totalorder %s2349_s1, %s2097_s19  ;;  %s30_s16 = int_to_ptr.vmem [resolvable:$true] %s29_s16 }
   0x4   :  { %p2101_p1 = scmp.lt.u32.totalorder %s2097_s19, %s2349_s1 }
   0x6   :  { %p2103_p2 = pnand %p2101_p1, %p2098_p0 }
   0x8   :  { %2106 = shalt.err (!%p2103_p2)
}
   0x9   :  { %s2107_s24 = scalar_lea.vmem %s30_s16, 16384  ;;  %p2112_p4 = scmp.lt.s32.totalorder %s30_s16, %s30_s16 }
   0xa   :  { %p2108_p3 = scmp.ne.s32.totalorder %s30_s16, %s2107_s24  ;;  %p2113_p5 = scmp.lt.s32.totalorder %s2107_s24, %s2107_s24 }
   0xc   :  { %p2114_p6 = por %p2113_p5, %p2112_p4 }
   0xe   :  { %p2115_p7 = pnand %p2114_p6, %p2108_p3 }
  0x10   :  { %2118 = shalt.err (!%p2115_p7)
}
  0x11   :  { %s2192_s25 = smov 128   ;;  %s2193_s26 = smov 8  }
  0x12   :  { %35 = dma.hbm_to_vmem [thread:$0]  %s2349_s1, 16384, %s30_s16, [#allocation6], %s2192_s25, %s2192_s25, %s2193_s26  }
  0x13   :  { %s2194_s29 = smov [#allocation2]   ;;  %s2119_s7 = scalar_lea.hbm %s2348_s0, 8192 }
  0x14   :  { %s17_s30 = sshll.u32 %s2194_s29, 4  ;;  %p2120_p8 = scmp.ne.s32.totalorder %s2348_s0, %s2119_s7  ;;  %s18_s30 = int_to_ptr.vmem [resolvable:$true] %s17_s30 }
  0x15   :  { %p2123_p9 = scmp.lt.u32.totalorder %s2119_s7, %s2348_s0 }
  0x17   :  { %p2125_p10 = pnand %p2123_p9, %p2120_p8 }
  0x19   :  { %2128 = shalt.err (!%p2125_p10)
}
  0x1a   :  { %s2129_s12 = scalar_lea.vmem %s18_s30, 8192  ;;  %p2134_p12 = scmp.lt.s32.totalorder %s18_s30, %s18_s30 }
  0x1b   :  { %p2130_p11 = scmp.ne.s32.totalorder %s18_s30, %s2129_s12  ;;  %p2135_p13 = scmp.lt.s32.totalorder %s2129_s12, %s2129_s12 }
  0x1d   :  { %p2136_p0 = por %p2135_p13, %p2134_p12 }
  0x1f   :  { %p2137_p1 = pnand %p2136_p0, %p2130_p11 }
  0x21   :  { %2140 = shalt.err (!%p2137_p1)
}
  0x22   :  { %s2195_s1 = smov 1024   ;;  %s2196_s13 = smov 64  }
  0x23   :  { %23 = dma.hbm_to_vmem [thread:$0]  %s2348_s0, 8192, %s18_s30, [#allocation3], %s2195_s1, %s2195_s1, %s2196_s13  }
  0x24   :  { %s2197_s16 = smov [#allocation7]   ;;  %s2141_s20 = scalar_lea.hbm %s2350_s2, 10240 }
  0x25   :  { %s41_s17 = sshll.u32 %s2197_s16, 4  ;;  %p2142_p2 = scmp.ne.s32.totalorder %s2350_s2, %s2141_s20  ;;  %s42_s17 = int_to_ptr.vmem [resolvable:$true] %s41_s17 }
  0x26   :  { %p2145_p3 = scmp.lt.u32.totalorder %s2141_s20, %s2350_s2 }
  0x28   :  { %p2147_p4 = pnand %p2145_p3, %p2142_p2 }
  0x2a   :  { %2150 = shalt.err (!%p2147_p4)
}
  0x2b   :  { %s2151_s27 = scalar_lea.vmem %s42_s17, 10240  ;;  %p2156_p6 = scmp.lt.s32.totalorder %s42_s17, %s42_s17 }
  0x2c   :  { %p2152_p5 = scmp.ne.s32.totalorder %s42_s17, %s2151_s27  ;;  %p2157_p7 = scmp.lt.s32.totalorder %s2151_s27, %s2151_s27 }
  0x2e   :  { %p2158_p8 = por %p2157_p7, %p2156_p6 }
  0x30   :  { %p2159_p9 = pnand %p2158_p8, %p2152_p5 }
  0x32   :  { %2162 = shalt.err (!%p2159_p9)
}
  0x33   :  { %47 = dma.hbm_to_vmem [thread:$0]  %s2350_s2, 10240, %s42_s17, [#allocation6], %s2192_s25, %s2192_s25, %s2193_s26  }
  0x34   :  { %2185 = dma.done.wait [#allocation3], 8192  }
  0x35   :  { %2186 = vsyncadd [#allocation3], 4294959104 }
  0x36   :  { %2187 = dma.done.wait [#allocation6], 26624  }
  0x37   :  { %2188 = vsyncadd [#allocation6], 4294940672  ;;  %v140_v0 = vld [vmem:[#allocation5 + $0x80] sm:$0xff]  ;;  %v141_v1 = vld [vmem:[#allocation5 + $0x88] sm:$0xff]  ;;  %vm2199_vm0 = vmmov 0   ;;  %vm1020_vm1 = vcmask 1041409  }
  0x38   :  { %v124_v2 = vld [vmem:[#allocation5] sm:$0xff]  ;;  %v1822_v3 = vpack.c.bf16 %v141_v1, %v140_v0  ;;  %v125_v4 = vld [vmem:[#allocation5 + $0x8] sm:$0xff]  ;;  %v142_v11 = vld [vmem:[#allocation5 + $0x90] sm:$0xff]  ;;  %vm1022_vm2 = vcmask 1042434   ;;  %vm1024_vm3 = vcmask 1043459   ;;  %vm1026_vm4 = vcmask 1044484  }
  0x39   :  { %v172_v5 = vld [vmem:[#allocation5 + $0x180] sm:$0xff]  ;;  %v173_v6 = vld [vmem:[#allocation5 + $0x188] sm:$0xff]  ;;  %v1824_v7 = vpack.c.bf16 %v125_v4, %v124_v2  ;;  %v143_v13 = vld [vmem:[#allocation5 + $0x98] sm:$0xff]  ;;  %vm1028_vm5 = vcmask 1045509   ;;  %vm1030_vm6 = vcmask 1046534   ;;  %vm1032_vm7 = vcmask 1047559  }
  0x3a   :  { %v1854_v8 = vpack.c.bf16 %v173_v6, %v172_v5  ;;  %v156_v9 = vld [vmem:[#allocation5 + $0x100] sm:$0xff]  ;;  %v157_v10 = vld [vmem:[#allocation5 + $0x108] sm:$0xff]  ;;  %1823 = vmatprep.subr.bf16.mxu0 %v1822_v3  ;;  %v126_v14 = vld [vmem:[#allocation5 + $0x10] sm:$0xff]  ;;  %v1826_v16 = vpack.c.bf16 %v143_v13, %v142_v11 }
  0x3b   :  { %v1856_v12 = vpack.c.bf16 %v157_v10, %v156_v9  ;;  %v127_v15 = vld [vmem:[#allocation5 + $0x18] sm:$0xff]  ;;  %1825 = vmatpush3.bf16.msra.mxu0 %v1824_v7  ;;  %v174_v18 = vld [vmem:[#allocation5 + $0x190] sm:$0xff]  ;;  %v144_v23 = vld [vmem:[#allocation5 + $0xa0] sm:$0xff] }
  0x3c   :  { %1855 = vmatprep.subr.bf16.mxu1 %v1854_v8  ;;  %v1828_v17 = vpack.c.bf16 %v127_v15, %v126_v14  ;;  %v175_v19 = vld [vmem:[#allocation5 + $0x198] sm:$0xff]  ;;  %v158_v20 = vld [vmem:[#allocation5 + $0x110] sm:$0xff]  ;;  %v145_v24 = vld [vmem:[#allocation5 + $0xa8] sm:$0xff]  ;;  %1827 = vmatprep.subr.bf16.mxu0 %v1826_v16 }
  0x3d   :  { %1857 = vmatpush3.bf16.msra.mxu1 %v1856_v12  ;;  %v1858_v21 = vpack.c.bf16 %v175_v19, %v174_v18  ;;  %v159_v22 = vld [vmem:[#allocation5 + $0x118] sm:$0xff]  ;;  %v1830_v26 = vpack.c.bf16 %v145_v24, %v144_v23  ;;  %v128_v27 = vld [vmem:[#allocation5 + $0x20] sm:$0xff]  ;;  %v129_v28 = vld [vmem:[#allocation5 + $0x28] sm:$0xff] }
  0x3e   :  { %v1860_v25 = vpack.c.bf16 %v159_v22, %v158_v20  ;;  %v176_v29 = vld [vmem:[#allocation5 + $0x1a0] sm:$0xff]  ;;  %v177_v30 = vld [vmem:[#allocation5 + $0x1a8] sm:$0xff]  ;;  %v1832_v33 = vpack.c.bf16 %v129_v28, %v128_v27  ;;  %v146_v35 = vld [vmem:[#allocation5 + $0xb0] sm:$0xff] }
  0x3f   :  { %1859 = vmatprep.subr.bf16.mxu1 %v1858_v21  ;;  %v160_v31 = vld [vmem:[#allocation5 + $0x120] sm:$0xff]  ;;  %v161_v32 = vld [vmem:[#allocation5 + $0x128] sm:$0xff]  ;;  %1829 = vmatpush3.bf16.msra.mxu0 %v1828_v17  ;;  %v1862_v34 = vpack.c.bf16 %v177_v30, %v176_v29  ;;  %v147_v36 = vld [vmem:[#allocation5 + $0xb8] sm:$0xff] }
  0x40   :  { %v130_v37 = vld [vmem:[#allocation5 + $0x30] sm:$0xff]  ;;  %1831 = vmatprep.subr.bf16.mxu0 %v1830_v26  ;;  %v1864_v38 = vpack.c.bf16 %v161_v32, %v160_v31  ;;  %v1834_v39 = vpack.c.bf16 %v147_v36, %v146_v35  ;;  %v131_v40 = vld [vmem:[#allocation5 + $0x38] sm:$0xff]  ;;  %v148_v46 = vld [vmem:[#allocation5 + $0xc0] sm:$0xff] }
  0x41   :  { %1861 = vmatpush3.bf16.msra.mxu1 %v1860_v25  ;;  %v178_v41 = vld [vmem:[#allocation5 + $0x1b0] sm:$0xff]  ;;  %v179_v42 = vld [vmem:[#allocation5 + $0x1b8] sm:$0xff]  ;;  %v149_v47 = vld [vmem:[#allocation5 + $0xc8] sm:$0xff]  ;;  %v1836_v48 = vpack.c.bf16 %v131_v40, %v130_v37 }
  0x42   :  { %1863 = vmatprep.subr.bf16.mxu1 %v1862_v34  ;;  %v1866_v43 = vpack.c.bf16 %v179_v42, %v178_v41  ;;  %v162_v44 = vld [vmem:[#allocation5 + $0x130] sm:$0xff]  ;;  %v163_v45 = vld [vmem:[#allocation5 + $0x138] sm:$0xff]  ;;  %v180_v49 = vld [vmem:[#allocation5 + $0x1c0] sm:$0xff]  ;;  %v1838_v52 = vpack.c.bf16 %v149_v47, %v148_v46 }
  0x43   :  { %1833 = vmatpush3.bf16.msra.mxu0 %v1832_v33  ;;  %v181_v50 = vld [vmem:[#allocation5 + $0x1c8] sm:$0xff]  ;;  %v1868_v51 = vpack.c.bf16 %v163_v45, %v162_v44  ;;  %v132_v53 = vld [vmem:[#allocation5 + $0x40] sm:$0xff]  ;;  %v150_v58 = vld [vmem:[#allocation5 + $0xd0] sm:$0xff] }
  0x44   :  { %1835 = vmatprep.subr.bf16.mxu0 %v1834_v39  ;;  %v133_v54 = vld [vmem:[#allocation5 + $0x48] sm:$0xff]  ;;  %v164_v55 = vld [vmem:[#allocation5 + $0x140] sm:$0xff]  ;;  %v1870_v56 = vpack.c.bf16 %v181_v50, %v180_v49  ;;  %v151_v59 = vld [vmem:[#allocation5 + $0xd8] sm:$0xff] }
  0x45   :  { %1865 = vmatpush3.bf16.msra.mxu1 %v1864_v38  ;;  %v165_v57 = vld [vmem:[#allocation5 + $0x148] sm:$0xff]  ;;  %v182_v60 = vld [vmem:[#allocation5 + $0x1d0] sm:$0xff]  ;;  %v183_v61 = vld [vmem:[#allocation5 + $0x1d8] sm:$0xff]  ;;  %v1840_v62 = vpack.c.bf16 %v133_v54, %v132_v53  ;;  %v1842_v0 = vpack.c.bf16 %v151_v59, %v150_v58 }
  0x46   :  { %1867 = vmatprep.subr.bf16.mxu1 %v1866_v43  ;;  %v1872_v63 = vpack.c.bf16 %v165_v57, %v164_v55  ;;  %v134_v1 = vld [vmem:[#allocation5 + $0x50] sm:$0xff]  ;;  %v135_v2 = vld [vmem:[#allocation5 + $0x58] sm:$0xff]  ;;  %v1874_v4 = vpack.c.bf16 %v183_v61, %v182_v60  ;;  %v152_v6 = vld [vmem:[#allocation5 + $0xe0] sm:$0xff] }
  0x47   :  { %1837 = vmatpush3.bf16.msra.mxu0 %v1836_v48  ;;  %v166_v3 = vld [vmem:[#allocation5 + $0x150] sm:$0xff]  ;;  %v167_v5 = vld [vmem:[#allocation5 + $0x158] sm:$0xff]  ;;  %v153_v7 = vld [vmem:[#allocation5 + $0xe8] sm:$0xff]  ;;  %v1844_v10 = vpack.c.bf16 %v135_v2, %v134_v1 }
  0x48   :  { %1839 = vmatprep.subr.bf16.mxu0 %v1838_v52  ;;  %v184_v8 = vld [vmem:[#allocation5 + $0x1e0] sm:$0xff]  ;;  %v185_v9 = vld [vmem:[#allocation5 + $0x1e8] sm:$0xff]  ;;  %v1876_v13 = vpack.c.bf16 %v167_v5, %v166_v3  ;;  %v1846_v14 = vpack.c.bf16 %v153_v7, %v152_v6  ;;  %v154_v19 = vld [vmem:[#allocation5 + $0xf0] sm:$0xff] }
  0x49   :  { %1869 = vmatpush3.bf16.msra.mxu1 %v1868_v51  ;;  %v136_v11 = vld [vmem:[#allocation5 + $0x60] sm:$0xff]  ;;  %v60_v12 = vld [vmem:[#allocation2 + $0x8] sm:$0xff]  ;;  %v1878_v18 = vpack.c.bf16 %v185_v9, %v184_v8  ;;  %v155_v20 = vld [vmem:[#allocation5 + $0xf8] sm:$0xff] }
  0x4a   :  { %1871 = vmatprep.subr.bf16.mxu1 %v1870_v56  ;;  %v137_v15 = vld [vmem:[#allocation5 + $0x68] sm:$0xff]  ;;  %v168_v16 = vld [vmem:[#allocation5 + $0x160] sm:$0xff]  ;;  %320 = vmatprep.mubr.f32.mxu0 %v60_v12  ;;  %v62_v21 = vld [vmem:[#allocation2 + $0x18] sm:$0xff]  ;;  %v1850_v26 = vpack.c.bf16 %v155_v20, %v154_v19 }
  0x4b   :  { %1841 = vmatpush3.bf16.msra.mxu0 %v1840_v62  ;;  %v169_v17 = vld [vmem:[#allocation5 + $0x168] sm:$0xff]  ;;  %v186_v22 = vld [vmem:[#allocation5 + $0x1f0] sm:$0xff]  ;;  %v187_v23 = vld [vmem:[#allocation5 + $0x1f8] sm:$0xff]  ;;  %425 = vmatprep.mubr.f32.mxu1 %v62_v21  ;;  %v1848_v24 = vpack.c.bf16 %v137_v15, %v136_v11 }
  0x4c   :  { %1843 = vmatprep.subr.bf16.mxu0 %v1842_v0  ;;  %v1880_v25 = vpack.c.bf16 %v169_v17, %v168_v16  ;;  %v138_v27 = vld [vmem:[#allocation5 + $0x70] sm:$0xff]  ;;  %v139_v28 = vld [vmem:[#allocation5 + $0x78] sm:$0xff]  ;;  %v1882_v30 = vpack.c.bf16 %v187_v23, %v186_v22  ;;  %v204_v32 = vld [vmem:[#allocation5 + $0x280] sm:$0xff] }
  0x4d   :  { %1873 = vmatpush3.bf16.msra.mxu1 %v1872_v63  ;;  %v170_v29 = vld [vmem:[#allocation5 + $0x170] sm:$0xff]  ;;  %v171_v31 = vld [vmem:[#allocation5 + $0x178] sm:$0xff]  ;;  %v205_v33 = vld [vmem:[#allocation5 + $0x288] sm:$0xff]  ;;  %v1852_v36 = vpack.c.bf16 %v139_v28, %v138_v27 }
  0x4e   :  { %1875 = vmatprep.subr.bf16.mxu1 %v1874_v4  ;;  %v236_v34 = vld [vmem:[#allocation5 + $0x380] sm:$0xff]  ;;  %v237_v35 = vld [vmem:[#allocation5 + $0x388] sm:$0xff]  ;;  %v1884_v37 = vpack.c.bf16 %v171_v31, %v170_v29  ;;  %v1886_v38 = vpack.c.bf16 %v205_v33, %v204_v32  ;;  %v206_v44 = vld [vmem:[#allocation5 + $0x290] sm:$0xff] }
  0x4f   :  { %1845 = vmatpush3.bf16.msra.mxu0 %v1844_v10  ;;  %v188_v39 = vld [vmem:[#allocation5 + $0x200] sm:$0xff]  ;;  %v189_v40 = vld [vmem:[#allocation5 + $0x208] sm:$0xff]  ;;  %v1918_v41 = vpack.c.bf16 %v237_v35, %v236_v34  ;;  %v207_v45 = vld [vmem:[#allocation5 + $0x298] sm:$0xff] }
  0x50   :  { %1847 = vmatprep.subr.bf16.mxu0 %v1846_v14  ;;  %v220_v42 = vld [vmem:[#allocation5 + $0x300] sm:$0xff]  ;;  %v221_v43 = vld [vmem:[#allocation5 + $0x308] sm:$0xff]  ;;  %v1888_v47 = vpack.c.bf16 %v189_v40, %v188_v39  ;;  %v238_v48 = vld [vmem:[#allocation5 + $0x390] sm:$0xff]  ;;  %v1890_v55 = vpack.c.bf16 %v207_v45, %v206_v44 }
  0x51   :  { %1877 = vmatpush3.bf16.msra.mxu1 %v1876_v13  ;;  %v59_v46 = vld [vmem:[#allocation2] sm:$0xff]  ;;  %v239_v49 = vld [vmem:[#allocation5 + $0x398] sm:$0xff]  ;;  %v61_v50 = vld [vmem:[#allocation2 + $0x10] sm:$0xff]  ;;  %v1920_v51 = vpack.c.bf16 %v221_v43, %v220_v42 }
  0x52   :  { %1879 = vmatprep.subr.bf16.mxu1 %v1878_v18  ;;  %v190_v52 = vld [vmem:[#allocation5 + $0x210] sm:$0xff]  ;;  %v191_v53 = vld [vmem:[#allocation5 + $0x218] sm:$0xff]  ;;  %v68_v54 = vld [vmem:[#allocation2 + $0x48] sm:$0xff]  ;;  %v1922_v59 = vpack.c.bf16 %v239_v49, %v238_v48 }
  0x53   :  { %1849 = vmatpush3.bf16.msra.mxu0 %v1848_v24  ;;  %v222_v56 = vld [vmem:[#allocation5 + $0x310] sm:$0xff]  ;;  %v223_v57 = vld [vmem:[#allocation5 + $0x318] sm:$0xff]  ;;  %v208_v60 = vld [vmem:[#allocation5 + $0x2a0] sm:$0xff]  ;;  %v1892_v63 = vpack.c.bf16 %v191_v53, %v190_v52 }
  0x54   :  { %1851 = vmatprep.subr.bf16.mxu0 %v1850_v26  ;;  %v70_v58 = vld [vmem:[#allocation2 + $0x58] sm:$0xff]  ;;  %v209_v61 = vld [vmem:[#allocation5 + $0x2a8] sm:$0xff]  ;;  %v67_v62 = vld [vmem:[#allocation2 + $0x40] sm:$0xff]  ;;  %v1924_v3 = vpack.c.bf16 %v223_v57, %v222_v56 }
  0x55   :  { %1881 = vmatpush3.bf16.msra.mxu1 %v1880_v25  ;;  %v240_v0 = vld [vmem:[#allocation5 + $0x3a0] sm:$0xff]  ;;  %v241_v1 = vld [vmem:[#allocation5 + $0x3a8] sm:$0xff]  ;;  %v69_v2 = vld [vmem:[#allocation2 + $0x50] sm:$0xff]  ;;  %v1894_v7 = vpack.c.bf16 %v209_v61, %v208_v60 }
  0x56   :  { %1883 = vmatprep.subr.bf16.mxu1 %v1882_v30  ;;  %v192_v4 = vld [vmem:[#allocation5 + $0x220] sm:$0xff]  ;;  %v193_v5 = vld [vmem:[#allocation5 + $0x228] sm:$0xff]  ;;  %v78_v10 = vld [vmem:[#allocation2 + $0x98] sm:$0xff]  ;;  %v1926_v11 = vpack.c.bf16 %v241_v1, %v240_v0 }
  0x57   :  { %1853 = vmatpush3.bf16.msra.mxu0 %v1852_v36  ;;  %v76_v6 = vld [vmem:[#allocation2 + $0x88] sm:$0xff]  ;;  %v224_v8 = vld [vmem:[#allocation5 + $0x320] sm:$0xff]  ;;  %v210_v12 = vld [vmem:[#allocation5 + $0x2b0] sm:$0xff]  ;;  %v1896_v15 = vpack.c.bf16 %v193_v5, %v192_v4 }
  0x58   :  { %1887 = vmatprep.subr.bf16.mxu0 %v1886_v38  ;;  %v225_v9 = vld [vmem:[#allocation5 + $0x328] sm:$0xff]  ;;  %v211_v13 = vld [vmem:[#allocation5 + $0x2b8] sm:$0xff]  ;;  %v75_v14 = vld [vmem:[#allocation2 + $0x80] sm:$0xff] }
  0x59   :  { %1885 = vmatpush3.bf16.msra.mxu1 %v1884_v37  ;;  %v242_v16 = vld [vmem:[#allocation5 + $0x3b0] sm:$0xff]  ;;  %v243_v17 = vld [vmem:[#allocation5 + $0x3b8] sm:$0xff]  ;;  %v1928_v19 = vpack.c.bf16 %v225_v9, %v224_v8  ;;  %v84_v22 = vld [vmem:[#allocation2 + $0xc8] sm:$0xff]  ;;  %v1898_v23 = vpack.c.bf16 %v211_v13, %v210_v12 }
  0x5a   :  { %1919 = vmatprep.subr.bf16.mxu1 %v1918_v41  ;;  %321 = vmatmul.mubr.f32.vlgmr.msra.gmra.mrb[0].mxu0 %v59_v46  ;;  %v77_v18 = vld [vmem:[#allocation2 + $0x90] sm:$0xff]  ;;  %v195_v21 = vld [vmem:[#allocation5 + $0x238] sm:$0xff]  ;;  %v1930_v27 = vpack.c.bf16 %v243_v17, %v242_v16  ;;  %v212_v28 = vld [vmem:[#allocation5 + $0x2c0] sm:$0xff] }
  0x5b   :  { %1889 = vmatpush3.bf16.msra.mxu0 %v1888_v47  ;;  %325 = vmatprep.mubr.f32.mxu0 %v68_v54  ;;  %v194_v20 = vld [vmem:[#allocation5 + $0x230] sm:$0xff]  ;;  %v227_v25 = vld [vmem:[#allocation5 + $0x338] sm:$0xff]  ;;  %v213_v29 = vld [vmem:[#allocation5 + $0x2c8] sm:$0xff] }
  0x5c   :  { %426 = vmatmul.mubr.f32.vlgmr.msra.gmra.mrb[0].mxu1 %v61_v50  ;;  %1891 = vmatprep.subr.bf16.mxu0 %v1890_v55  ;;  %v226_v24 = vld [vmem:[#allocation5 + $0x330] sm:$0xff]  ;;  %v86_v26 = vld [vmem:[#allocation2 + $0xd8] sm:$0xff]  ;;  %v83_v30 = vld [vmem:[#allocation2 + $0xc0] sm:$0xff]  ;;  %v1900_v31 = vpack.c.bf16 %v195_v21, %v194_v20  ;;  %v1902_v39 = vpack.c.bf16 %v213_v29, %v212_v28 }
  0x5d   :  { %1921 = vmatpush3.bf16.msra.mxu1 %v1920_v51  ;;  %430 = vmatprep.mubr.f32.mxu1 %v70_v58  ;;  %v244_v32 = vld [vmem:[#allocation5 + $0x3c0] sm:$0xff]  ;;  %v245_v33 = vld [vmem:[#allocation5 + $0x3c8] sm:$0xff]  ;;  %v85_v34 = vld [vmem:[#allocation2 + $0xd0] sm:$0xff]  ;;  %v1932_v35 = vpack.c.bf16 %v227_v25, %v226_v24 }
  0x5e   :  { %326 = vmatmul.mubr.f32.gmra.mrb[2].mxu0 %v67_v62  ;;  %1923 = vmatprep.subr.bf16.mxu1 %v1922_v59  ;;  %v196_v36 = vld [vmem:[#allocation5 + $0x240] sm:$0xff]  ;;  %v197_v37 = vld [vmem:[#allocation5 + $0x248] sm:$0xff]  ;;  %v94_v42 = vld [vmem:[#allocation2 + $0x118] sm:$0xff]  ;;  %v1934_v43 = vpack.c.bf16 %v245_v33, %v244_v32 }
  0x5f   :  { %1893 = vmatpush3.bf16.msra.mxu0 %v1892_v63  ;;  %330 = vmatprep.mubr.f32.mxu0 %v76_v6  ;;  %v92_v38 = vld [vmem:[#allocation2 + $0x108] sm:$0xff]  ;;  %v228_v40 = vld [vmem:[#allocation5 + $0x340] sm:$0xff]  ;;  %v214_v44 = vld [vmem:[#allocation5 + $0x2d0] sm:$0xff]  ;;  %v1904_v47 = vpack.c.bf16 %v197_v37, %v196_v36 }
  0x60   :  { %431 = vmatmul.mubr.f32.gmra.mrb[2].mxu1 %v69_v2  ;;  %1895 = vmatprep.subr.bf16.mxu0 %v1894_v7  ;;  %v229_v41 = vld [vmem:[#allocation5 + $0x348] sm:$0xff]  ;;  %v215_v45 = vld [vmem:[#allocation5 + $0x2d8] sm:$0xff]  ;;  %v91_v46 = vld [vmem:[#allocation2 + $0x100] sm:$0xff] }
  0x61   :  { %1925 = vmatpush3.bf16.msra.mxu1 %v1924_v3  ;;  %435 = vmatprep.mubr.f32.mxu1 %v78_v10  ;;  %v246_v48 = vld [vmem:[#allocation5 + $0x3d0] sm:$0xff]  ;;  %v247_v49 = vld [vmem:[#allocation5 + $0x3d8] sm:$0xff]  ;;  %v1936_v51 = vpack.c.bf16 %v229_v41, %v228_v40  ;;  %v100_v54 = vld [vmem:[#allocation2 + $0x148] sm:$0xff]  ;;  %v1906_v55 = vpack.c.bf16 %v215_v45, %v214_v44 }
  0x62   :  { %331 = vmatmul.mubr.f32.gmra.mrb[4].mxu0 %v75_v14  ;;  %1927 = vmatprep.subr.bf16.mxu1 %v1926_v11  ;;  %v93_v50 = vld [vmem:[#allocation2 + $0x110] sm:$0xff]  ;;  %v199_v53 = vld [vmem:[#allocation5 + $0x258] sm:$0xff]  ;;  %v1938_v59 = vpack.c.bf16 %v247_v49, %v246_v48  ;;  %v216_v60 = vld [vmem:[#allocation5 + $0x2e0] sm:$0xff] }
  0x63   :  { %1897 = vmatpush3.bf16.msra.mxu0 %v1896_v15  ;;  %335 = vmatprep.mubr.f32.mxu0 %v84_v22  ;;  %v198_v52 = vld [vmem:[#allocation5 + $0x250] sm:$0xff]  ;;  %v231_v57 = vld [vmem:[#allocation5 + $0x358] sm:$0xff]  ;;  %v217_v61 = vld [vmem:[#allocation5 + $0x2e8] sm:$0xff] }
  0x64   :  { %436 = vmatmul.mubr.f32.gmra.mrb[4].mxu1 %v77_v18  ;;  %1899 = vmatprep.subr.bf16.mxu0 %v1898_v23  ;;  %v230_v56 = vld [vmem:[#allocation5 + $0x350] sm:$0xff]  ;;  %v102_v58 = vld [vmem:[#allocation2 + $0x158] sm:$0xff]  ;;  %v99_v62 = vld [vmem:[#allocation2 + $0x140] sm:$0xff]  ;;  %v1908_v63 = vpack.c.bf16 %v199_v53, %v198_v52  ;;  %v1910_v7 = vpack.c.bf16 %v217_v61, %v216_v60 }
  0x65   :  { %1929 = vmatpush3.bf16.msra.mxu1 %v1928_v19  ;;  %440 = vmatprep.mubr.f32.mxu1 %v86_v26  ;;  %v248_v0 = vld [vmem:[#allocation5 + $0x3e0] sm:$0xff]  ;;  %v249_v1 = vld [vmem:[#allocation5 + $0x3e8] sm:$0xff]  ;;  %v101_v2 = vld [vmem:[#allocation2 + $0x150] sm:$0xff]  ;;  %v1940_v3 = vpack.c.bf16 %v231_v57, %v230_v56 }
  0x66   :  { %336 = vmatmul.mubr.f32.gmra.mrb[6].mxu0 %v83_v30  ;;  %1931 = vmatprep.subr.bf16.mxu1 %v1930_v27  ;;  %v200_v4 = vld [vmem:[#allocation5 + $0x260] sm:$0xff]  ;;  %v201_v5 = vld [vmem:[#allocation5 + $0x268] sm:$0xff]  ;;  %v110_v10 = vld [vmem:[#allocation2 + $0x198] sm:$0xff]  ;;  %v1942_v11 = vpack.c.bf16 %v249_v1, %v248_v0 }
  0x67   :  { %1901 = vmatpush3.bf16.msra.mxu0 %v1900_v31  ;;  %340 = vmatprep.mubr.f32.mxu0 %v92_v38  ;;  %v108_v6 = vld [vmem:[#allocation2 + $0x188] sm:$0xff]  ;;  %v232_v8 = vld [vmem:[#allocation5 + $0x360] sm:$0xff]  ;;  %v218_v12 = vld [vmem:[#allocation5 + $0x2f0] sm:$0xff]  ;;  %v1912_v15 = vpack.c.bf16 %v201_v5, %v200_v4 }
  0x68   :  { %441 = vmatmul.mubr.f32.gmra.mrb[6].mxu1 %v85_v34  ;;  %1903 = vmatprep.subr.bf16.mxu0 %v1902_v39  ;;  %v233_v9 = vld [vmem:[#allocation5 + $0x368] sm:$0xff]  ;;  %v219_v13 = vld [vmem:[#allocation5 + $0x2f8] sm:$0xff]  ;;  %v107_v14 = vld [vmem:[#allocation2 + $0x180] sm:$0xff] }
  0x69   :  { %1933 = vmatpush3.bf16.msra.mxu1 %v1932_v35  ;;  %445 = vmatprep.mubr.f32.mxu1 %v94_v42  ;;  %v250_v16 = vld [vmem:[#allocation5 + $0x3f0] sm:$0xff]  ;;  %v251_v17 = vld [vmem:[#allocation5 + $0x3f8] sm:$0xff]  ;;  %v1944_v19 = vpack.c.bf16 %v233_v9, %v232_v8  ;;  %v116_v22 = vld [vmem:[#allocation2 + $0x1c8] sm:$0xff]  ;;  %v1914_v23 = vpack.c.bf16 %v219_v13, %v218_v12 }
  0x6a   :  { %341 = vmatmul.mubr.f32.gmra.mrb[8].mxu0 %v91_v46  ;;  %1935 = vmatprep.subr.bf16.mxu1 %v1934_v43  ;;  %v109_v18 = vld [vmem:[#allocation2 + $0x190] sm:$0xff]  ;;  %v203_v21 = vld [vmem:[#allocation5 + $0x278] sm:$0xff]  ;;  %v1946_v27 = vpack.c.bf16 %v251_v17, %v250_v16  ;;  %v115_v28 = vld [vmem:[#allocation2 + $0x1c0] sm:$0xff] }
  0x6b   :  { %1905 = vmatpush3.bf16.msra.mxu0 %v1904_v47  ;;  %345 = vmatprep.mubr.f32.mxu0 %v100_v54  ;;  %v202_v20 = vld [vmem:[#allocation5 + $0x270] sm:$0xff]  ;;  %v235_v25 = vld [vmem:[#allocation5 + $0x378] sm:$0xff]  ;;  %v64_v32 = vld [vmem:[#allocation2 + $0x28] sm:$0xff] }
  0x6c   :  { %446 = vmatmul.mubr.f32.gmra.mrb[8].mxu1 %v93_v50  ;;  %1907 = vmatprep.subr.bf16.mxu0 %v1906_v55  ;;  %v234_v24 = vld [vmem:[#allocation5 + $0x370] sm:$0xff]  ;;  %v118_v26 = vld [vmem:[#allocation2 + $0x1d8] sm:$0xff]  ;;  %v1916_v29 = vpack.c.bf16 %v203_v21, %v202_v20  ;;  %v63_v34 = vld [vmem:[#allocation2 + $0x20] sm:$0xff] }
  0x6d   :  { %1937 = vmatpush3.bf16.msra.mxu1 %v1936_v51  ;;  %450 = vmatprep.mubr.f32.mxu1 %v102_v58  ;;  %v117_v30 = vld [vmem:[#allocation2 + $0x1d0] sm:$0xff]  ;;  %v1948_v31 = vpack.c.bf16 %v235_v25, %v234_v24  ;;  %v66_v33 = vld [vmem:[#allocation2 + $0x38] sm:$0xff]  ;;  %v72_v36 = vld [vmem:[#allocation2 + $0x68] sm:$0xff] }
  0x6e   :  { %346 = vmatmul.mubr.f32.gmra.mrb[10].mxu0 %v99_v62  ;;  %1939 = vmatprep.subr.bf16.mxu1 %v1938_v59  ;;  %v65_v35 = vld [vmem:[#allocation2 + $0x30] sm:$0xff]  ;;  %v74_v37 = vld [vmem:[#allocation2 + $0x78] sm:$0xff]  ;;  %v71_v38 = vld [vmem:[#allocation2 + $0x60] sm:$0xff] }
  0x6f   :  { %1909 = vmatpush3.bf16.msra.mxu0 %v1908_v63  ;;  %350 = vmatprep.mubr.f32.mxu0 %v108_v6  ;;  %v73_v39 = vld [vmem:[#allocation2 + $0x70] sm:$0xff]  ;;  %v80_v40 = vld [vmem:[#allocation2 + $0xa8] sm:$0xff]  ;;  %v82_v41 = vld [vmem:[#allocation2 + $0xb8] sm:$0xff] }
  0x70   :  { %451 = vmatmul.mubr.f32.gmra.mrb[10].mxu1 %v101_v2  ;;  %1911 = vmatprep.subr.bf16.mxu0 %v1910_v7  ;;  %v79_v42 = vld [vmem:[#allocation2 + $0xa0] sm:$0xff]  ;;  %v81_v43 = vld [vmem:[#allocation2 + $0xb0] sm:$0xff]  ;;  %v88_v44 = vld [vmem:[#allocation2 + $0xe8] sm:$0xff] }
  0x71   :  { %1941 = vmatpush3.bf16.msra.mxu1 %v1940_v3  ;;  %455 = vmatprep.mubr.f32.mxu1 %v110_v10  ;;  %v90_v45 = vld [vmem:[#allocation2 + $0xf8] sm:$0xff]  ;;  %v87_v46 = vld [vmem:[#allocation2 + $0xe0] sm:$0xff]  ;;  %v89_v47 = vld [vmem:[#allocation2 + $0xf0] sm:$0xff] }
  0x72   :  { %351 = vmatmul.mubr.f32.gmra.mrb[12].mxu0 %v107_v14  ;;  %1943 = vmatprep.subr.bf16.mxu1 %v1942_v11  ;;  %v96_v48 = vld [vmem:[#allocation2 + $0x128] sm:$0xff]  ;;  %v98_v49 = vld [vmem:[#allocation2 + $0x138] sm:$0xff]  ;;  %v95_v50 = vld [vmem:[#allocation2 + $0x120] sm:$0xff] }
  0x73   :  { %1913 = vmatpush3.bf16.msra.mxu0 %v1912_v15  ;;  %355 = vmatprep.mubr.f32.mxu0 %v116_v22  ;;  %v97_v51 = vld [vmem:[#allocation2 + $0x130] sm:$0xff]  ;;  %v104_v52 = vld [vmem:[#allocation2 + $0x168] sm:$0xff]  ;;  %v106_v53 = vld [vmem:[#allocation2 + $0x178] sm:$0xff] }
  0x74   :  { %456 = vmatmul.mubr.f32.gmra.mrb[12].mxu1 %v109_v18  ;;  %1915 = vmatprep.subr.bf16.mxu0 %v1914_v23  ;;  %v103_v54 = vld [vmem:[#allocation2 + $0x160] sm:$0xff]  ;;  %v105_v55 = vld [vmem:[#allocation2 + $0x170] sm:$0xff]  ;;  %v112_v56 = vld [vmem:[#allocation2 + $0x1a8] sm:$0xff] }
  0x75   :  { %1945 = vmatpush3.bf16.msra.mxu1 %v1944_v19  ;;  %460 = vmatprep.mubr.f32.mxu1 %v118_v26  ;;  %v114_v57 = vld [vmem:[#allocation2 + $0x1b8] sm:$0xff]  ;;  %v111_v58 = vld [vmem:[#allocation2 + $0x1a0] sm:$0xff]  ;;  %v113_v59 = vld [vmem:[#allocation2 + $0x1b0] sm:$0xff] }
  0x76   :  { %356 = vmatmul.mubr.f32.gmra.mrb[14].mxu0 %v115_v28  ;;  %1947 = vmatprep.subr.bf16.mxu1 %v1946_v27  ;;  %v120_v60 = vld [vmem:[#allocation2 + $0x1e8] sm:$0xff]  ;;  %v122_v61 = vld [vmem:[#allocation2 + $0x1f8] sm:$0xff]  ;;  %v119_v62 = vld [vmem:[#allocation2 + $0x1e0] sm:$0xff] }
  0x77   :  { %1917 = vmatpush3.bf16.msra.mxu0 %v1916_v29  ;;  %530 = vmatprep.mubr.f32.mxu0 %v64_v32  ;;  %v121_v63 = vld [vmem:[#allocation2 + $0x1f0] sm:$0xff]  ;;  %v684_v0 = vld [vmem:[#allocation7] sm:$0xff]  ;;  %v685_v1 = vld [vmem:[#allocation7 + $0x8] sm:$0xff] }
  0x78   :  { %461 = vmatmul.mubr.f32.gmra.mrb[14].mxu1 %v117_v30  ;;  %v1950_v2 = vpack.c.bf16 %v685_v1, %v684_v0  ;;  %v686_v3 = vld [vmem:[#allocation7 + $0x10] sm:$0xff]  ;;  %v687_v4 = vld [vmem:[#allocation7 + $0x18] sm:$0xff]  ;;  %v688_v6 = vld [vmem:[#allocation7 + $0x20] sm:$0xff] }
  0x79   :  { %1949 = vmatpush3.bf16.msra.mxu1 %v1948_v31  ;;  %635 = vmatprep.mubr.f32.mxu1 %v66_v33  ;;  %v1954_v5 = vpack.c.bf16 %v687_v4, %v686_v3  ;;  %v689_v7 = vld [vmem:[#allocation7 + $0x28] sm:$0xff]  ;;  %v690_v9 = vld [vmem:[#allocation7 + $0x30] sm:$0xff]  ;;  %v691_v10 = vld [vmem:[#allocation7 + $0x38] sm:$0xff] }
  0x7a   :  { %531 = vmatmul.mubr.f32.vlgmr.msra.gmra.mrb[16].mxu0 %v63_v34  ;;  %1951 = vmatprep.subr.bf16.mxu0 %v1950_v2  ;;  %v1958_v8 = vpack.c.bf16 %v689_v7, %v688_v6  ;;  %v1962_v11 = vpack.c.bf16 %v691_v10, %v690_v9  ;;  %v692_v12 = vld [vmem:[#allocation7 + $0x40] sm:$0xff]  ;;  %v693_v13 = vld [vmem:[#allocation7 + $0x48] sm:$0xff]  ;;  %v694_v15 = vld [vmem:[#allocation7 + $0x50] sm:$0xff] }
  0x7b   :  { %535 = vmatprep.mubr.f32.mxu0 %v72_v36  ;;  %1953 = vmatpush3.bf16.msra.mxu0 %v1950_v2  ;;  %v1966_v14 = vpack.c.bf16 %v693_v13, %v692_v12  ;;  %v695_v16 = vld [vmem:[#allocation7 + $0x58] sm:$0xff]  ;;  %v696_v18 = vld [vmem:[#allocation7 + $0x60] sm:$0xff]  ;;  %v697_v19 = vld [vmem:[#allocation7 + $0x68] sm:$0xff] }
  0x7c   :  { %636 = vmatmul.mubr.f32.vlgmr.msra.gmra.mrb[16].mxu1 %v65_v35  ;;  %1955 = vmatprep.subr.bf16.mxu0 %v1954_v5  ;;  %v1970_v17 = vpack.c.bf16 %v695_v16, %v694_v15  ;;  %v1974_v20 = vpack.c.bf16 %v697_v19, %v696_v18  ;;  %v698_v21 = vld [vmem:[#allocation7 + $0x70] sm:$0xff]  ;;  %v699_v22 = vld [vmem:[#allocation7 + $0x78] sm:$0xff]  ;;  %v818_v24 = vld [vmem:[#allocation7 + $0x80] sm:$0xff] }
  0x7d   :  { %640 = vmatprep.mubr.f32.mxu1 %v74_v37  ;;  %v1978_v23 = vpack.c.bf16 %v699_v22, %v698_v21  ;;  %v819_v25 = vld [vmem:[#allocation7 + $0x88] sm:$0xff]  ;;  %v820_v26 = vld [vmem:[#allocation7 + $0x90] sm:$0xff]  ;;  %v821_v28 = vld [vmem:[#allocation7 + $0x98] sm:$0xff] }
  0x7e   :  { %536 = vmatmul.mubr.f32.gmra.mrb[18].mxu0 %v71_v38  ;;  %v1982_v27 = vpack.c.bf16 %v819_v25, %v818_v24  ;;  %v1986_v29 = vpack.c.bf16 %v821_v28, %v820_v26  ;;  %v822_v30 = vld [vmem:[#allocation7 + $0xa0] sm:$0xff]  ;;  %v823_v31 = vld [vmem:[#allocation7 + $0xa8] sm:$0xff]  ;;  %v824_v33 = vld [vmem:[#allocation7 + $0xb0] sm:$0xff] }
  0x7f   :  { %540 = vmatprep.mubr.f32.mxu0 %v80_v40  ;;  %1957 = vmatpush3.bf16.msra.mxu0 %v1954_v5  ;;  %v1990_v32 = vpack.c.bf16 %v823_v31, %v822_v30  ;;  %v825_v34 = vld [vmem:[#allocation7 + $0xb8] sm:$0xff]  ;;  %v826_v36 = vld [vmem:[#allocation7 + $0xc0] sm:$0xff]  ;;  %v827_v37 = vld [vmem:[#allocation7 + $0xc8] sm:$0xff] }
  0x80   :  { %641 = vmatmul.mubr.f32.gmra.mrb[18].mxu1 %v73_v39  ;;  %1959 = vmatprep.subr.bf16.mxu0 %v1958_v8  ;;  %v1994_v35 = vpack.c.bf16 %v825_v34, %v824_v33  ;;  %v1998_v38 = vpack.c.bf16 %v827_v37, %v826_v36  ;;  %v828_v39 = vld [vmem:[#allocation7 + $0xd0] sm:$0xff]  ;;  %v829_v40 = vld [vmem:[#allocation7 + $0xd8] sm:$0xff] }
  0x81   :  { %645 = vmatprep.mubr.f32.mxu1 %v82_v41  ;;  %1983 = vmatprep.subr.bf16.mxu1 %v1982_v27  ;;  %v2002_v41 = vpack.c.bf16 %v829_v40, %v828_v39 }
  0x82   :  { %541 = vmatmul.mubr.f32.gmra.mrb[20].mxu0 %v79_v42  ;;  %1985 = vmatpush3.bf16.msra.mxu1 %v1982_v27  ;;  %v830_v42 = vld [vmem:[#allocation7 + $0xe0] sm:$0xff] }
  0x83   :  { %545 = vmatprep.mubr.f32.mxu0 %v88_v44  ;;  %1961 = vmatpush3.bf16.msra.mxu0 %v1958_v8 }
  0x84   :  { %646 = vmatmul.mubr.f32.gmra.mrb[20].mxu1 %v81_v43  ;;  %1963 = vmatprep.subr.bf16.mxu0 %v1962_v11  ;;  %v831_v43 = vld [vmem:[#allocation7 + $0xe8] sm:$0xff] }
  0x85   :  { %650 = vmatprep.mubr.f32.mxu1 %v90_v45  ;;  %1987 = vmatprep.subr.bf16.mxu1 %v1986_v29  ;;  %v2006_v44 = vpack.c.bf16 %v831_v43, %v830_v42  ;;  %v252_v45 = vlaneseq }
  0x86   :  { %546 = vmatmul.mubr.f32.gmra.mrb[22].mxu0 %v87_v46  ;;  %1989 = vmatpush3.bf16.msra.mxu1 %v1986_v29 }
  0x87   :  { %550 = vmatprep.mubr.f32.mxu0 %v96_v48  ;;  %1965 = vmatpush3.bf16.msra.mxu0 %v1962_v11  ;;  %v2269_v46 = vshrl.u32 %v252_v45, 7  ;;  %v2275_v48 = vld [vmem:[%s2351_s3] sm:$0x3f]  ;;  %s2201_s3 = smov [#allocation8]  }
  0x88   :  { %651 = vmatmul.mubr.f32.gmra.mrb[22].mxu1 %v89_v47  ;;  %1967 = vmatprep.subr.bf16.mxu0 %v1966_v14  ;;  %s1296_s26 = sshll.u32 %s2201_s3, 4  ;;  %s1297_s26 = int_to_ptr.vmem [resolvable:$true] %s1296_s26 }
  0x89   :  { %655 = vmatprep.mubr.f32.mxu1 %v98_v49  ;;  %1991 = vmatprep.subr.bf16.mxu1 %v1990_v32  ;;  %v254_v47 = vsub.s32 0, %v2269_v46  ;;  %s2163_s29 = scalar_lea.vmem %s1297_s26, 128  ;;  %p2168_p11 = scmp.lt.s32.totalorder %s1297_s26, %s1297_s26 }
  0x8a   :  { %551 = vmatmul.mubr.f32.gmra.mrb[24].mxu0 %v95_v50  ;;  %1993 = vmatpush3.bf16.msra.mxu1 %v1990_v32  ;;  %p2164_p10 = scmp.ne.s32.totalorder %s1297_s26, %s2163_s29  ;;  %p2169_p12 = scmp.lt.s32.totalorder %s2163_s29, %s2163_s29 }
  0x8b   :  { %555 = vmatprep.mubr.f32.mxu0 %v104_v52  ;;  %1969 = vmatpush3.bf16.msra.mxu0 %v1966_v14  ;;  %v255_v50 = vrot.slane %v2275_v48, %v254_v47 }
  0x8c   :  { %656 = vmatmul.mubr.f32.gmra.mrb[24].mxu1 %v97_v51  ;;  %1971 = vmatprep.subr.bf16.mxu0 %v1970_v17  ;;  %p2170_p13 = por %p2169_p12, %p2168_p11 }
  0x8d   :  { %660 = vmatprep.mubr.f32.mxu1 %v106_v53  ;;  %1995 = vmatprep.subr.bf16.mxu1 %v1994_v35 }
  0x8e   :  { %556 = vmatmul.mubr.f32.gmra.mrb[26].mxu0 %v103_v54  ;;  %1997 = vmatpush3.bf16.msra.mxu1 %v1994_v35  ;;  %p2171_p0 = pnand %p2170_p13, %p2164_p10 }
  0x8f   :  { %560 = vmatprep.mubr.f32.mxu0 %v112_v56  ;;  %1973 = vmatpush3.bf16.msra.mxu0 %v1970_v17 }
  0x90   :  { %661 = vmatmul.mubr.f32.gmra.mrb[26].mxu1 %v105_v55  ;;  %1975 = vmatprep.subr.bf16.mxu0 %v1974_v20 }
  0x91   :  { %665 = vmatprep.mubr.f32.mxu1 %v114_v57  ;;  %1999 = vmatprep.subr.bf16.mxu1 %v1998_v38 }
  0x92   :  { %561 = vmatmul.mubr.f32.gmra.mrb[28].mxu0 %v111_v58  ;;  %2001 = vmatpush3.bf16.msra.mxu1 %v1998_v38 }
  0x93   :  { %565 = vmatprep.mubr.f32.mxu0 %v120_v60  ;;  %1977 = vmatpush3.bf16.msra.mxu0 %v1974_v20 }
  0x94   :  { %666 = vmatmul.mubr.f32.gmra.mrb[28].mxu1 %v113_v59  ;;  %1979 = vmatprep.subr.bf16.mxu0 %v1978_v23 }
  0x95   :  { %670 = vmatprep.mubr.f32.mxu1 %v122_v61  ;;  %2003 = vmatprep.subr.bf16.mxu1 %v2002_v41 }
  0x96   :  { %566 = vmatmul.mubr.f32.gmra.mrb[30].mxu0 %v119_v62  ;;  %2005 = vmatpush3.bf16.msra.mxu1 %v2002_v41 }
  0x97   :  { %1981 = vmatpush3.bf16.msra.mxu0 %v1978_v23  ;;  %2007 = vmatprep.subr.bf16.mxu1 %v2006_v44 }
  0x98   :  { %671 = vmatmul.mubr.f32.gmra.mrb[30].mxu1 %v121_v63 }
  0x9a   :  { %2009 = vmatpush3.bf16.msra.mxu1 %v2006_v44 }
 0x12d   :  { %v1338_v49 = vpop.f32.mrb[0].mxu0 }
 0x12e   :  { %v1339_v51 = vpop.f32.mrb[1].mxu0 }
 0x12f   :  { %v1394_v52 = vpop.f32.mrb[0].mxu1  ;;  %v1340_v53 = vadd.f32 %v1339_v51, %v1338_v49 }
 0x130   :  { %v1395_v54 = vpop.f32.mrb[1].mxu1 }
 0x131   :  { %v1396_v55 = vadd.f32 %v1395_v54, %v1394_v52  ;;  %v323_v56 = vadd.f32 %v1340_v53, %v255_v50  ;;  %v1341_v57 = vpop.f32.mrb[2].mxu0 }
 0x132   :  { %v1342_v58 = vpop.f32.mrb[3].mxu0 }
 0x133   :  { %v1397_v59 = vpop.f32.mrb[2].mxu1  ;;  %v428_v60 = vadd.f32 %v1396_v55, %v323_v56  ;;  %v1343_v61 = vadd.f32 %v1342_v58, %v1341_v57 }
 0x134   :  { %v1398_v62 = vpop.f32.mrb[3].mxu1 }
 0x135   :  { %v1399_v63 = vadd.f32 %v1398_v62, %v1397_v59  ;;  %v328_v0 = vadd.f32 %v1343_v61, %v255_v50  ;;  %v1344_v1 = vpop.f32.mrb[4].mxu0 }
 0x136   :  { %v1345_v2 = vpop.f32.mrb[5].mxu0 }
 0x137   :  { %v1400_v3 = vpop.f32.mrb[4].mxu1  ;;  %v433_v4 = vadd.f32 %v1399_v63, %v328_v0  ;;  %v1346_v5 = vadd.f32 %v1345_v2, %v1344_v1 }
 0x138   :  { %v1401_v6 = vpop.f32.mrb[5].mxu1 }
 0x139   :  { %v1402_v7 = vadd.f32 %v1401_v6, %v1400_v3  ;;  %v333_v8 = vadd.f32 %v1346_v5, %v255_v50  ;;  %v1347_v9 = vpop.f32.mrb[6].mxu0 }
 0x13a   :  { %v1348_v10 = vpop.f32.mrb[7].mxu0 }
 0x13b   :  { %v1403_v11 = vpop.f32.mrb[6].mxu1  ;;  %v2278_v12 = vadd.f32 %v1402_v7, %v333_v8  ;;  %v1349_v13 = vadd.f32 %v1348_v10, %v1347_v9 }
 0x13c   :  { %v1404_v14 = vpop.f32.mrb[7].mxu1 }
 0x13d   :  { %v1405_v15 = vadd.f32 %v1404_v14, %v1403_v11  ;;  %v338_v16 = vadd.f32 %v1349_v13, %v255_v50  ;;  %v1350_v17 = vpop.f32.mrb[8].mxu0 }
 0x13e   :  { %v1351_v18 = vpop.f32.mrb[9].mxu0 }
 0x13f   :  { %v1406_v19 = vpop.f32.mrb[8].mxu1  ;;  %v2280_v20 = vadd.f32 %v1405_v15, %v338_v16  ;;  %v1352_v21 = vadd.f32 %v1351_v18, %v1350_v17 }
 0x140   :  { %v1407_v22 = vpop.f32.mrb[9].mxu1 }
 0x141   :  { %v1408_v23 = vadd.f32 %v1407_v22, %v1406_v19  ;;  %v343_v24 = vadd.f32 %v1352_v21, %v255_v50  ;;  %v1353_v25 = vpop.f32.mrb[10].mxu0 }
 0x142   :  { %v1354_v26 = vpop.f32.mrb[11].mxu0 }
 0x143   :  { %v1409_v27 = vpop.f32.mrb[10].mxu1  ;;  %v2282_v28 = vadd.f32 %v1408_v23, %v343_v24  ;;  %v1355_v29 = vadd.f32 %v1354_v26, %v1353_v25 }
 0x144   :  { %v1410_v30 = vpop.f32.mrb[11].mxu1 }
 0x145   :  { %v1411_v31 = vadd.f32 %v1410_v30, %v1409_v27  ;;  %v348_v32 = vadd.f32 %v1355_v29, %v255_v50  ;;  %v1356_v33 = vpop.f32.mrb[12].mxu0 }
 0x146   :  { %v1357_v34 = vpop.f32.mrb[13].mxu0 }
 0x147   :  { %v1412_v35 = vpop.f32.mrb[12].mxu1  ;;  %v2284_v36 = vadd.f32 %v1411_v31, %v348_v32  ;;  %v1358_v37 = vadd.f32 %v1357_v34, %v1356_v33 }
 0x148   :  { %v1413_v38 = vpop.f32.mrb[13].mxu1 }
 0x149   :  { %v1414_v39 = vadd.f32 %v1413_v38, %v1412_v35  ;;  %v353_v40 = vadd.f32 %v1358_v37, %v255_v50  ;;  %v1359_v41 = vpop.f32.mrb[14].mxu0 }
 0x14a   :  { %v1360_v42 = vpop.f32.mrb[15].mxu0 }
 0x14b   :  { %v1415_v43 = vpop.f32.mrb[14].mxu1  ;;  %v2286_v44 = vadd.f32 %v1414_v39, %v353_v40  ;;  %v1361_v45 = vadd.f32 %v1360_v42, %v1359_v41 }
 0x14c   :  { %v1416_v47 = vpop.f32.mrb[15].mxu1 }
 0x14d   :  { %v1417_v49 = vadd.f32 %v1416_v47, %v1415_v43  ;;  %v358_v51 = vadd.f32 %v1361_v45, %v255_v50  ;;  %v1450_v52 = vpop.f32.mrb[16].mxu0 }
 0x14e   :  { %v1451_v53 = vpop.f32.mrb[17].mxu0 }
 0x14f   :  { %v1506_v54 = vpop.f32.mrb[16].mxu1  ;;  %v2288_v55 = vadd.f32 %v1417_v49, %v358_v51  ;;  %v1452_v56 = vadd.f32 %v1451_v53, %v1450_v52 }
 0x150   :  { %v1507_v57 = vpop.f32.mrb[17].mxu1 }
 0x151   :  { %v1508_v58 = vadd.f32 %v1507_v57, %v1506_v54  ;;  %v533_v59 = vadd.f32 %v1452_v56, %v428_v60  ;;  %v1453_v61 = vpop.f32.mrb[18].mxu0 }
 0x152   :  { %v1454_v62 = vpop.f32.mrb[19].mxu0 }
 0x153   :  { %v1509_v63 = vpop.f32.mrb[18].mxu1  ;;  %v638_v0 = vadd.f32 %v1508_v58, %v533_v59  ;;  %v1455_v1 = vadd.f32 %v1454_v62, %v1453_v61 }
 0x154   :  { %v1510_v2 = vpop.f32.mrb[19].mxu1 }
 0x155   :  { %v1511_v3 = vadd.f32 %v1510_v2, %v1509_v63  ;;  %v676_v5 = vmax.f32 %v638_v0, 0.0  ;;  %v538_v6 = vadd.f32 %v1455_v1, %v433_v4  ;;  %v1456_v7 = vpop.f32.mrb[20].mxu0  ;;  %v832_v2 = vld [vmem:[#allocation7 + $0xf0] sm:$0xff] }
 0x156   :  { %v1457_v50 = vpop.f32.mrb[21].mxu0 }
 0x157   :  { %v1512_v8 = vpop.f32.mrb[20].mxu1  ;;  %v643_v9 = vadd.f32 %v1511_v3, %v538_v6  ;;  %v1458_v10 = vadd.f32 %v1457_v50, %v1456_v7  ;;  %1661 = vmatprep.mubr.f32.mxu0 %v676_v5  ;;  %v833_v3 = vld [vmem:[#allocation7 + $0xf8] sm:$0xff] }
 0x158   :  { %v1513_v11 = vpop.f32.mrb[21].mxu1  ;;  %v2010_v5 = vpack.c.bf16 %v833_v3, %v832_v2  ;;  %v1112_v2 = vld [vmem:[#allocation7 + $0x1a8] sm:$0xff] }
 0x159   :  { %v1514_v13 = vadd.f32 %v1513_v11, %v1512_v8  ;;  %v677_v14 = vmax.f32 %v643_v9, 0.0  ;;  %v543_v60 = vadd.f32 %v1458_v10, %v2278_v12  ;;  %v1459_v15 = vpop.f32.mrb[22].mxu0 }
 0x15a   :  { %v1460_v16 = vpop.f32.mrb[23].mxu0  ;;  %2011 = vmatprep.subr.bf16.mxu1 %v2010_v5 }
 0x15b   :  { %v1515_v17 = vpop.f32.mrb[22].mxu1  ;;  %v648_v18 = vadd.f32 %v1514_v13, %v543_v60  ;;  %v1461_v19 = vadd.f32 %v1460_v16, %v1459_v15  ;;  %1662 = vmatmul.mubr.f32.vlgmr.msra.gmra.mrb[32].mxu0 %v677_v14  ;;  %2013 = vmatpush3.bf16.msra.mxu1 %v2010_v5  ;;  %v1113_v5 = vld [vmem:[#allocation7 + $0x1b0] sm:$0xff] }
 0x15c   :  { %v1516_v21 = vpop.f32.mrb[23].mxu1 }
 0x15d   :  { %v1517_v22 = vadd.f32 %v1516_v21, %v1515_v17  ;;  %v678_v4 = vmax.f32 %v648_v18, 0.0  ;;  %v548_v23 = vadd.f32 %v1461_v19, %v2280_v20  ;;  %v1462_v24 = vpop.f32.mrb[24].mxu0 }
 0x15e   :  { %v1463_v25 = vpop.f32.mrb[25].mxu0 }
 0x15f   :  { %v1518_v26 = vpop.f32.mrb[24].mxu1  ;;  %v653_v27 = vadd.f32 %v1517_v22, %v548_v23  ;;  %v1464_v29 = vadd.f32 %v1463_v25, %v1462_v24  ;;  %1664 = vmatprep.mubr.f32.mxu0 %v678_v4 }
 0x160   :  { %v1519_v30 = vpop.f32.mrb[25].mxu1 }
 0x161   :  { %v1520_v31 = vadd.f32 %v1519_v30, %v1518_v26  ;;  %v679_v12 = vmax.f32 %v653_v27, 0.0  ;;  %v553_v32 = vadd.f32 %v1464_v29, %v2282_v28  ;;  %v1465_v33 = vpop.f32.mrb[26].mxu0  ;;  %v992_v30 = vld [vmem:[#allocation7 + $0x100] sm:$0xff] }
 0x162   :  { %v1466_v34 = vpop.f32.mrb[27].mxu0 }
 0x163   :  { %v1521_v35 = vpop.f32.mrb[26].mxu1  ;;  %v658_v37 = vadd.f32 %v1520_v31, %v553_v32  ;;  %v1467_v38 = vadd.f32 %v1466_v34, %v1465_v33  ;;  %1665 = vmatmul.mubr.f32.gmra.mrb[34].mxu0 %v679_v12  ;;  %v993_v31 = vld [vmem:[#allocation7 + $0x108] sm:$0xff]  ;;  %v2198_v32 = vmov 0.0|0.0   ;;  %v994_v33 = vld [vmem:[#allocation7 + $0x110] sm:$0xff]  ;;  %v995_v34 = vld [vmem:[#allocation7 + $0x118] sm:$0xff] }
 0x164   :  { %v1522_v39 = vpop.f32.mrb[27].mxu1  ;;  %v2015_v12 = vpack.c.bf16 %v993_v31, %v992_v30  ;;  %2014 = vmatprep.subr.bf16.mxu0 %v2198_v32  ;;  %2038 = vmatprep.subr.bf16.mxu1 %v2198_v32 }
 0x165   :  { %v1523_v40 = vadd.f32 %v1522_v39, %v1521_v35  ;;  %v680_v20 = vmax.f32 %v658_v37, 0.0  ;;  %v558_v41 = vadd.f32 %v1467_v38, %v2284_v36  ;;  %v1468_v42 = vpop.f32.mrb[28].mxu0  ;;  %v2018_v35 = vpack.c.bf16 %v995_v34, %v994_v33  ;;  %v996_v37 = vld [vmem:[#allocation7 + $0x120] sm:$0xff]  ;;  %v997_v38 = vld [vmem:[#allocation7 + $0x128] sm:$0xff] }
 0x166   :  { %v1469_v43 = vpop.f32.mrb[29].mxu0  ;;  %2016 = vmatpush3.bf16.msra.mxu0 %v2015_v12  ;;  %v2021_v39 = vpack.c.bf16 %v997_v38, %v996_v37 }
 0x167   :  { %v1524_v45 = vpop.f32.mrb[28].mxu1  ;;  %v663_v47 = vadd.f32 %v1523_v40, %v558_v41  ;;  %v1470_v49 = vadd.f32 %v1469_v43, %v1468_v42  ;;  %1667 = vmatprep.mubr.f32.mxu0 %v680_v20  ;;  %2017 = vmatprep.subr.bf16.mxu0 %v2198_v32  ;;  %v998_v40 = vld [vmem:[#allocation7 + $0x130] sm:$0xff]  ;;  %v999_v20 = vld [vmem:[#allocation7 + $0x138] sm:$0xff]  ;;  %v1000_v42 = vld [vmem:[#allocation7 + $0x140] sm:$0xff] }
 0x168   :  { %v1525_v51 = vpop.f32.mrb[29].mxu1  ;;  %v2024_v41 = vpack.c.bf16 %v999_v20, %v998_v40  ;;  %v1001_v43 = vld [vmem:[#allocation7 + $0x148] sm:$0xff] }
 0x169   :  { %v1526_v52 = vadd.f32 %v1525_v51, %v1524_v45  ;;  %v681_v28 = vmax.f32 %v663_v47, 0.0  ;;  %v563_v53 = vadd.f32 %v1470_v49, %v2286_v44  ;;  %v1471_v54 = vpop.f32.mrb[30].mxu0  ;;  %v702_v44 = vsub.s32 1, %v2269_v46  ;;  %v1002_v47 = vld [vmem:[#allocation7 + $0x150] sm:$0xff]  ;;  %v1003_v49 = vld [vmem:[#allocation7 + $0x158] sm:$0xff] }
 0x16a   :  { %v1472_v56 = vpop.f32.mrb[31].mxu0  ;;  %2019 = vmatpush3.bf16.msra.mxu0 %v2018_v35  ;;  %v2027_v45 = vpack.c.bf16 %v1001_v43, %v1000_v42  ;;  %v2030_v51 = vpack.c.bf16 %v1003_v49, %v1002_v47 }
 0x16b   :  { %v1527_v57 = vpop.f32.mrb[30].mxu1  ;;  %v668_v58 = vadd.f32 %v1526_v52, %v563_v53  ;;  %v1473_v59 = vadd.f32 %v1472_v56, %v1471_v54  ;;  %1668 = vmatmul.mubr.f32.gmra.mrb[36].mxu0 %v681_v28  ;;  %v703_v6 = vrot.slane %v2275_v48, %v702_v44  ;;  %2020 = vmatprep.subr.bf16.mxu0 %v2198_v32  ;;  %v1004_v52 = vld [vmem:[#allocation7 + $0x160] sm:$0xff]  ;;  %v1005_v28 = vld [vmem:[#allocation7 + $0x168] sm:$0xff]  ;;  %v1006_v54 = vld [vmem:[#allocation7 + $0x170] sm:$0xff] }
 0x16c   :  { %v1528_v61 = vpop.f32.mrb[31].mxu1  ;;  %v2033_v53 = vpack.c.bf16 %v1005_v28, %v1004_v52  ;;  %v1007_v56 = vld [vmem:[#allocation7 + $0x178] sm:$0xff] }
 0x16d   :  { %v1529_v62 = vadd.f32 %v1528_v61, %v1527_v57  ;;  %v682_v36 = vmax.f32 %v668_v58, 0.0  ;;  %v568_v63 = vadd.f32 %v1473_v59, %v2288_v55  ;;  %v2036_v57 = vpack.c.bf16 %v1007_v56, %v1006_v54  ;;  %v1107_v59 = vld [vmem:[#allocation7 + $0x180] sm:$0xff]  ;;  %v1108_v61 = vld [vmem:[#allocation7 + $0x188] sm:$0xff]  ;;  %v1114_v44 = vld [vmem:[#allocation7 + $0x1b8] sm:$0xff] }
 0x16e   :  { %2022 = vmatpush3.bf16.msra.mxu0 %v2021_v39  ;;  %v2200_v58 = vmov 0.0  }
 0x16f   :  { %v673_v0 = vadd.f32 %v1529_v62, %v568_v63  ;;  %1670 = vmatprep.mubr.f32.mxu0 %v682_v36  ;;  %2023 = vmatprep.subr.bf16.mxu0 %v2198_v32  ;;  %v1109_v62 = vld [vmem:[#allocation7 + $0x190] sm:$0xff]  ;;  %v2039_v36 = vpack.c.bf16 %v1108_v61, %v1107_v59  ;;  %v1110_v63 = vld [vmem:[#allocation7 + $0x198] sm:$0xff] }
 0x171   :  { %v683_v1 = vmax.f32 %v673_v0, 0.0  ;;  %v2042_v0 = vpack.c.bf16 %v1110_v63, %v1109_v62 }
 0x172   :  { %2025 = vmatpush3.bf16.msra.mxu0 %v2024_v41 }
 0x173   :  { %1671 = vmatmul.mubr.f32.gmra.mrb[38].mxu0 %v683_v1  ;;  %2026 = vmatprep.subr.bf16.mxu0 %v2198_v32  ;;  %v1111_v1 = vld [vmem:[#allocation7 + $0x1a0] sm:$0xff] }
 0x174   :  { %1749 = vmatprep.mubr.msk.f32.mxu0 %vm2199_vm0, %v2200_v58  ;;  %v2045_v3 = vpack.c.bf16 %v1112_v2, %v1111_v1 }
 0x176   :  { %2028 = vmatpush3.bf16.msra.mxu0 %v2027_v45 }
 0x177   :  { %2029 = vmatprep.subr.bf16.mxu0 %v2198_v32 }
 0x17a   :  { %2031 = vmatpush3.bf16.msra.mxu0 %v2030_v51 }
 0x17b   :  { %2032 = vmatprep.subr.bf16.mxu0 %v2198_v32 }
 0x17e   :  { %2034 = vmatpush3.bf16.msra.mxu0 %v2033_v53 }
 0x17f   :  { %2035 = vmatprep.subr.bf16.mxu0 %v2198_v32 }
 0x182   :  { %2037 = vmatpush3.bf16.msra.mxu0 %v2036_v57 }
 0x183   :  { %2062 = vmatprep.subr.bf16.mxu0 %v2198_v32 }
 0x22e   :  { %v1663_v7 = vpop.f32.mrb[32].mxu0 }
 0x22f   :  { %v776_v50 = vadd.f32 %v1663_v7, %v703_v6  ;;  %v770_v8 = vpop.f32.mrb[33].mxu0  ;;  %v1115_v7 = vld [vmem:[#allocation7 + $0x1c0] sm:$0xff] }
 0x230   :  { %v771_v9 = vadd.f32 %v770_v8, %v703_v6 }
 0x231   :  { %v810_v11 = vmax.f32 %v776_v50, 0.0  ;;  %v1116_v50 = vld [vmem:[#allocation7 + $0x1c8] sm:$0xff] }
 0x232   :  { %v809_v10 = vmax.f32 %v771_v9, 0.0  ;;  %v2051_v8 = vpack.c.bf16 %v1116_v50, %v1115_v7  ;;  %v1117_v9 = vld [vmem:[#allocation7 + $0x1d0] sm:$0xff] }
 0x234   :  { %1705 = vmatprep.mubr.f32.mxu1 %v809_v10  ;;  %v1118_v10 = vld [vmem:[#allocation7 + $0x1d8] sm:$0xff] }
 0x235   :  { %1706 = vmatmul.mubr.f32.vlgmr.msra.gmra.mrb[32].mxu1 %v810_v11  ;;  %v2054_v11 = vpack.c.bf16 %v1118_v10, %v1117_v9 }
 0x236   :  { %v1666_v55 = vpop.f32.mrb[34].mxu0  ;;  %2040 = vmatpush3.bf16.msra.mxu1 %v2039_v36 }
 0x237   :  { %v786_v13 = vadd.f32 %v1666_v55, %v703_v6  ;;  %v780_v14 = vpop.f32.mrb[35].mxu0  ;;  %2041 = vmatprep.subr.bf16.mxu1 %v2198_v32  ;;  %v1119_v55 = vld [vmem:[#allocation7 + $0x1e0] sm:$0xff] }
 0x238   :  { %v781_v60 = vadd.f32 %v780_v14, %v703_v6 }
 0x239   :  { %v812_v16 = vmax.f32 %v786_v13, 0.0  ;;  %v1120_v13 = vld [vmem:[#allocation7 + $0x1e8] sm:$0xff] }
 0x23a   :  { %v811_v15 = vmax.f32 %v781_v60, 0.0  ;;  %2043 = vmatpush3.bf16.msra.mxu1 %v2042_v0  ;;  %v2057_v14 = vpack.c.bf16 %v1120_v13, %v1119_v55  ;;  %v836_v60 = vsub.s32 2, %v2269_v46 }
 0x23b   :  { %2044 = vmatprep.subr.bf16.mxu1 %v2198_v32 }
 0x23c   :  { %1708 = vmatprep.mubr.f32.mxu1 %v811_v15  ;;  %v837_v15 = vrot.slane %v2275_v48, %v836_v60 }
 0x23d   :  { %1709 = vmatmul.mubr.f32.gmra.mrb[34].mxu1 %v812_v16 }
 0x23e   :  { %v1669_v17 = vpop.f32.mrb[36].mxu0  ;;  %2046 = vmatpush3.bf16.msra.mxu1 %v2045_v3 }
 0x23f   :  { %v796_v18 = vadd.f32 %v1669_v17, %v703_v6  ;;  %v790_v19 = vpop.f32.mrb[37].mxu0  ;;  %2047 = vmatprep.subr.bf16.mxu1 %v2198_v32 }
 0x240   :  { %v791_v21 = vadd.f32 %v790_v19, %v703_v6 }
 0x241   :  { %v814_v4 = vmax.f32 %v796_v18, 0.0 }
 0x242   :  { %v813_v22 = vmax.f32 %v791_v21, 0.0 }
 0x244   :  { %1711 = vmatprep.mubr.f32.mxu1 %v813_v22 }
 0x245   :  { %1712 = vmatmul.mubr.f32.gmra.mrb[36].mxu1 %v814_v4 }
 0x246   :  { %v1672_v23 = vpop.f32.mrb[38].mxu0 }
 0x247   :  { %v806_v24 = vadd.f32 %v1672_v23, %v703_v6  ;;  %v800_v25 = vpop.f32.mrb[39].mxu0 }
 0x248   :  { %v801_v26 = vadd.f32 %v800_v25, %v703_v6  ;;  %v2048_v6 = vpack.c.bf16 %v1114_v44, %v1113_v5 }
 0x249   :  { %v816_v29 = vmax.f32 %v806_v24, 0.0 }
 0x24a   :  { %v815_v27 = vmax.f32 %v801_v26, 0.0  ;;  %2049 = vmatpush3.bf16.msra.mxu1 %v2048_v6 }
 0x24b   :  { %2050 = vmatprep.subr.bf16.mxu1 %v2198_v32 }
 0x24c   :  { %1714 = vmatprep.mubr.f32.mxu1 %v815_v27 }
 0x24d   :  { %1715 = vmatmul.mubr.f32.gmra.mrb[38].mxu1 %v816_v29 }
 0x24e   :  { %1784 = vmatprep.mubr.msk.f32.mxu1 %vm2199_vm0, %v2200_v58  ;;  %2052 = vmatpush3.bf16.msra.mxu1 %v2051_v8 }
 0x24f   :  { %2053 = vmatprep.subr.bf16.mxu1 %v2198_v32 }
 0x252   :  { %2055 = vmatpush3.bf16.msra.mxu1 %v2054_v11 }
 0x253   :  { %2056 = vmatprep.subr.bf16.mxu1 %v2198_v32 }
 0x256   :  { %2058 = vmatpush3.bf16.msra.mxu1 %v2057_v14 }
 0x257   :  { %2059 = vmatprep.subr.bf16.mxu1 %v2198_v32 }
 0x308   :  { %v1707_v16 = vpop.f32.mrb[32].mxu1 }
 0x309   :  { %v910_v17 = vadd.f32 %v1707_v16, %v837_v15  ;;  %v904_v18 = vpop.f32.mrb[33].mxu1 }
 0x30a   :  { %v905_v19 = vadd.f32 %v904_v18, %v837_v15 }
 0x30b   :  { %v949_v21 = vrot.slane %v910_v17, 4 }
 0x30c   :  { %v943_v22 = vrot.slane %v905_v19, 4 }
 0x30d   :  { %v950_v4 = vadd.f32 %v949_v21, %v910_v17 }
 0x30e   :  { %v944_v23 = vadd.f32 %v943_v22, %v905_v19 }
 0x30f   :  { %v951_v24 = vrot.slane %v950_v4, 2 }
 0x310   :  { %v945_v25 = vrot.slane %v944_v23, 2  ;;  %v1710_v26 = vpop.f32.mrb[34].mxu1 }
 0x311   :  { %v952_v27 = vadd.f32 %v951_v24, %v950_v4  ;;  %v920_v29 = vadd.f32 %v1710_v26, %v837_v15  ;;  %v914_v30 = vpop.f32.mrb[35].mxu1 }
 0x312   :  { %v946_v31 = vadd.f32 %v945_v25, %v944_v23  ;;  %v915_v12 = vadd.f32 %v914_v30, %v837_v15 }
 0x313   :  { %v953_v33 = vrot.slane %v952_v27, 1  ;;  %v961_v34 = vrot.slane %v920_v29, 4 }
 0x314   :  { %v947_v35 = vrot.slane %v946_v31, 1  ;;  %v955_v37 = vrot.slane %v915_v12, 4 }
 0x315   :  { %v954_v38 = vadd.f32 %v953_v33, %v952_v27  ;;  %v962_v39 = vadd.f32 %v961_v34, %v920_v29  ;;  %v1121_v27 = vld [vmem:[#allocation7 + $0x1f0] sm:$0xff]  ;;  %v1122_v29 = vld [vmem:[#allocation7 + $0x1f8] sm:$0xff] }
 0x316   :  { %v948_v40 = vadd.f32 %v947_v35, %v946_v31  ;;  %v956_v20 = vadd.f32 %v955_v37, %v915_v12  ;;  %v2060_v30 = vpack.c.bf16 %v1122_v29, %v1121_v27  ;;  %v1199_v31 = vld [vmem:[#allocation7 + $0x200] sm:$0xff]  ;;  %v1200_v12 = vld [vmem:[#allocation7 + $0x208] sm:$0xff]  ;;  %v1201_v33 = vld [vmem:[#allocation7 + $0x210] sm:$0xff] }
 0x317   :  { %v963_v41 = vrot.slane %v962_v39, 2  ;;  %v2063_v34 = vpack.c.bf16 %v1200_v12, %v1199_v31  ;;  %v1202_v35 = vld [vmem:[#allocation7 + $0x218] sm:$0xff] }
 0x318   :  { %v1021_v42 = vsel %vm1020_vm1, %v954_v38, %v948_v40  ;;  %v957_v43 = vrot.slane %v956_v20, 2  ;;  %v1713_v45 = vpop.f32.mrb[36].mxu1  ;;  %2061 = vmatpush3.bf16.msra.mxu1 %v2060_v30  ;;  %v2066_v37 = vpack.c.bf16 %v1202_v35, %v1201_v33  ;;  %v1203_v38 = vld [vmem:[#allocation7 + $0x220] sm:$0xff] }
 0x319   :  { %v964_v47 = vadd.f32 %v963_v41, %v962_v39  ;;  %v930_v49 = vadd.f32 %v1713_v45, %v837_v15  ;;  %v924_v51 = vpop.f32.mrb[37].mxu1  ;;  %v1204_v39 = vld [vmem:[#allocation7 + $0x228] sm:$0xff] }
 0x31a   :  { %v958_v52 = vadd.f32 %v957_v43, %v956_v20  ;;  %v925_v28 = vadd.f32 %v924_v51, %v837_v15  ;;  %v2069_v40 = vpack.c.bf16 %v1204_v39, %v1203_v38  ;;  %v1206_v20 = vld [vmem:[#allocation7 + $0x238] sm:$0xff]  ;;  %v1208_v43 = vld [vmem:[#allocation7 + $0x248] sm:$0xff] }
 0x31b   :  { %v965_v53 = vrot.slane %v964_v47, 1  ;;  %v973_v54 = vrot.slane %v930_v49, 4 }
 0x31c   :  { %v959_v56 = vrot.slane %v958_v52, 1  ;;  %v967_v57 = vrot.slane %v925_v28, 4 }
 0x31d   :  { %v974_v59 = vadd.f32 %v973_v54, %v930_v49  ;;  %v966_v36 = vadd.f32 %v965_v53, %v964_v47  ;;  %v1209_v47 = vld [vmem:[#allocation7 + $0x250] sm:$0xff]  ;;  %v1210_v49 = vld [vmem:[#allocation7 + $0x258] sm:$0xff]  ;;  %v1010_v54 = vsub.s32 3, %v2269_v46 }
 0x31e   :  { %v960_v61 = vadd.f32 %v959_v56, %v958_v52  ;;  %v968_v62 = vadd.f32 %v967_v57, %v925_v28  ;;  %v2078_v51 = vpack.c.bf16 %v1210_v49, %v1209_v47  ;;  %v1211_v52 = vld [vmem:[#allocation7 + $0x260] sm:$0xff]  ;;  %v1212_v28 = vld [vmem:[#allocation7 + $0x268] sm:$0xff] }
 0x31f   :  { %v975_v63 = vrot.slane %v974_v59, 2  ;;  %v2081_v53 = vpack.c.bf16 %v1212_v28, %v1211_v52  ;;  %v1011_v56 = vrot.slane %v2275_v48, %v1010_v54 }
 0x320   :  { %v1023_v0 = vsel %vm1022_vm2, %v960_v61, %v1021_v42  ;;  %v969_v1 = vrot.slane %v968_v62, 2  ;;  %v1716_v2 = vpop.f32.mrb[38].mxu1  ;;  %v1207_v42 = vld [vmem:[#allocation7 + $0x240] sm:$0xff] }
 0x321   :  { %v976_v3 = vadd.f32 %v975_v63, %v974_v59  ;;  %v1025_v5 = vsel %vm1024_vm3, %v966_v36, %v1023_v0  ;;  %v940_v44 = vadd.f32 %v1716_v2, %v837_v15  ;;  %v934_v6 = vpop.f32.mrb[39].mxu1  ;;  %v2075_v45 = vpack.c.bf16 %v1208_v43, %v1207_v42  ;;  %v1213_v36 = vld [vmem:[#allocation7 + $0x270] sm:$0xff]  ;;  %v1214_v63 = vld [vmem:[#allocation7 + $0x278] sm:$0xff] }
 0x322   :  { %v970_v7 = vadd.f32 %v969_v1, %v968_v62  ;;  %v935_v50 = vadd.f32 %v934_v6, %v837_v15  ;;  %v2084_v0 = vpack.c.bf16 %v1214_v63, %v1213_v36  ;;  %v1125_v1 = vsub.s32 4, %v2269_v46 }
 0x323   :  { %v977_v8 = vrot.slane %v976_v3, 1  ;;  %v985_v9 = vrot.slane %v940_v44, 4  ;;  %v1217_v6 = vsub.s32 5, %v2269_v46 }
 0x324   :  { %v971_v10 = vrot.slane %v970_v7, 1  ;;  %v979_v11 = vrot.slane %v935_v50, 4  ;;  %v1126_v2 = vrot.slane %v2275_v48, %v1125_v1 }
 0x325   :  { %v986_v55 = vadd.f32 %v985_v9, %v940_v44  ;;  %v978_v60 = vadd.f32 %v977_v8, %v976_v3 }
 0x326   :  { %v972_v13 = vadd.f32 %v971_v10, %v970_v7  ;;  %v980_v14 = vadd.f32 %v979_v11, %v935_v50  ;;  %v1218_v7 = vrot.slane %v2275_v48, %v1217_v6 }
 0x327   :  { %v987_v16 = vrot.slane %v986_v55, 2 }
 0x328   :  { %v1027_v17 = vsel %vm1026_vm4, %v972_v13, %v1025_v5  ;;  %v981_v18 = vrot.slane %v980_v14, 2 }
 0x329   :  { %v988_v19 = vadd.f32 %v987_v16, %v986_v55  ;;  %v1029_v21 = vsel %vm1028_vm5, %v978_v60, %v1027_v17 }
 0x32a   :  { %v982_v22 = vadd.f32 %v981_v18, %v980_v14 }
 0x32b   :  { %v989_v4 = vrot.slane %v988_v19, 1 }
 0x32c   :  { %v983_v23 = vrot.slane %v982_v22, 1 }
 0x32d   :  { %v990_v24 = vadd.f32 %v989_v4, %v988_v19 }
 0x32e   :  { %v984_v15 = vadd.f32 %v983_v23, %v982_v22 }
 0x330   :  { %v1031_v25 = vsel %vm1030_vm6, %v984_v15, %v1029_v21 }
 0x331   :  { %v1033_v26 = vsel %vm1032_vm7, %v990_v24, %v1031_v25 }
 0x332   :  { %1750 = vmatmul.mubr.f32.vlgmr.msra.gmra.mrb[40].mxu0 %v1033_v26 }
 0x333   :  { %1819 = vmatprep.mubr.msk.f32.mxu0 %vm2199_vm0, %v2200_v58  ;;  %2064 = vmatpush3.bf16.msra.mxu0 %v2063_v34  ;;  %v1205_v58 = vld [vmem:[#allocation7 + $0x230] sm:$0xff] }
 0x334   :  { %2065 = vmatprep.subr.bf16.mxu0 %v2198_v32  ;;  %v2072_v41 = vpack.c.bf16 %v1206_v20, %v1205_v58 }
 0x337   :  { %2067 = vmatpush3.bf16.msra.mxu0 %v2066_v37 }
 0x338   :  { %2068 = vmatprep.subr.bf16.mxu0 %v2198_v32 }
 0x33b   :  { %2070 = vmatpush3.bf16.msra.mxu0 %v2069_v40 }
 0x33c   :  { %2071 = vmatprep.subr.bf16.mxu0 %v2198_v32 }
 0x33f   :  { %2073 = vmatpush3.bf16.msra.mxu0 %v2072_v41 }
 0x340   :  { %2074 = vmatprep.subr.bf16.mxu0 %v2198_v32 }
 0x343   :  { %2076 = vmatpush3.bf16.msra.mxu0 %v2075_v45 }
 0x344   :  { %2077 = vmatprep.subr.bf16.mxu0 %v2198_v32 }
 0x347   :  { %2079 = vmatpush3.bf16.msra.mxu0 %v2078_v51 }
 0x348   :  { %2080 = vmatprep.subr.bf16.mxu0 %v2198_v32 }
 0x34b   :  { %2082 = vmatpush3.bf16.msra.mxu0 %v2081_v53 }
 0x34c   :  { %2083 = vmatprep.subr.bf16.mxu0 %v2198_v32 }
 0x34f   :  { %2085 = vmatpush3.bf16.msra.mxu0 %v2084_v0 }
 0x405   :  { %v1101_v57 = vpop.f32.mrb[40].mxu0 }
 0x406   :  { %v1102_v59 = vadd.f32 %v1101_v57, %v1011_v56  ;;  %v1751_v61 = vpop.f32.mrb[41].mxu0 }
 0x408   :  { %v1105_v62 = vmax.f32 %v1102_v59, 0.0 }
 0x40a   :  { %1785 = vmatmul.mubr.f32.vlgmr.msra.gmra.mrb[40].mxu1 %v1105_v62 }
 0x4dd   :  { %v1193_v3 = vpop.f32.mrb[40].mxu1 }
 0x4de   :  { %v1194_v5 = vadd.f32 %v1193_v3, %v1126_v2  ;;  %v1786_v32 = vpop.f32.mrb[41].mxu1 }
 0x4e0   :  { %v1197_v44 = vmax.f32 %v1194_v5, 0.0 }
 0x4e2   :  { %1820 = vmatmul.mubr.f32.vlgmr.msra.gmra.mrb[42].mxu0 %v1197_v44 }
 0x5b5   :  { %v1285_v50 = vpop.f32.mrb[42].mxu0 }
 0x5b6   :  { %v1286_v8 = vadd.f32 %v1285_v50, %v1218_v7  ;;  %v1821_v9 = vpop.f32.mrb[43].mxu0 }
 0x5b8   :  { %1289 = vst [vmem:[#allocation8] sm:$0xff] %v1286_v8 }
 0x5b9   :  { %2174 = shalt.err (!%p2171_p0)
}
 0x5ba   :  { %s2175_s6 = scalar_lea.hbm %s2352_s4, 128 }
 0x5bb   :  { %p2176_p1 = scmp.ne.s32.totalorder %s2352_s4, %s2175_s6  ;;  %p2179_p2 = scmp.lt.u32.totalorder %s2175_s6, %s2352_s4 }
 0x5bd   :  { %p2181_p3 = pnand %p2179_p2, %p2176_p1 }
 0x5bf   :  { %2184 = shalt.err (!%p2181_p3)
}
 0x5c0   :  { %1299 = dma.vmem_to_hbm [thread:$0]  %s1297_s26, 128, %s2352_s4, [#allocation4]  }
 0x5c1   :  { %2189 = dma.done.wait [#allocation4], 128  }
 0x5c2   :  { %2190 = vsyncadd [#allocation4], 4294967168 }
 0x5c3   :  { %1303 = vsyncpa [#allocation3], 1 }
 0x5c4   :  { %1304 = vsyncpa [#allocation6], 1 }
 0x5c5   :  { %1305 = vsyncpa [#allocation4], 1 }

</bundles_post_ra>
